<compile_context>
chip_gen: v6e
topology: v6e:2x2x1
jax: 0.10.0
libtpu: 0.0.40
codegen_flags: <defaults>
</compile_context>

<pallas_src>
import jax
import jax.numpy as jnp
from jax.experimental import pallas as pl
from jax.experimental.pallas import tpu as pltpu

IN_FEATURES = 6272
OUT_FEATURES = 7
N_PAD = 8            # pad output dim 7 -> 8 (block last dim == full array dim is legal)


def linear_kernel(x_ref, w_ref, b_ref, o_ref):
    """Single-step GEMV-ish linear: o = x @ w + b (bf16 operands, f32 accumulate)."""
    o_ref[...] = (
        jnp.dot(x_ref[...], w_ref[...], preferred_element_type=jnp.float32)
        + b_ref[...]
    )


def prepare_params(weight, bias):
    """One-time weight/bias preparation (do NOT redo per forward call).

    weight: [7, 6272] f32 (PyTorch layout)  ->  w_t:  [6272, 8] bf16 (transposed, zero-padded)
    bias:   [7]       f32                   ->  b_pad: [1, 8]    f32 (zero-padded)
    """
    w_t = (
        jnp.zeros((IN_FEATURES, N_PAD), dtype=jnp.bfloat16)
        .at[:, :OUT_FEATURES]
        .set(weight.T.astype(jnp.bfloat16))
    )
    b_pad = (
        jnp.zeros((1, N_PAD), dtype=jnp.float32)
        .at[0, :OUT_FEATURES]
        .set(bias.astype(jnp.float32))
    )
    return w_t, b_pad


def classifier_forward(x, w_t, b_pad):
    """Pallas equivalent of nn.Linear(6272, 7): y = x @ weight.T + bias.

    x:     [B, 6272] float32
    w_t:   [6272, 8] bfloat16 (prepared by prepare_params)
    b_pad: [1, 8]    float32  (prepared by prepare_params)
    returns [B, 7]   float32
    """
    B, K = x.shape
    assert K == IN_FEATURES
    assert w_t.shape == (IN_FEATURES, N_PAD)

    x_bf16 = x.astype(jnp.bfloat16)

    out_pad = pl.pallas_call(
        linear_kernel,
        out_shape=jax.ShapeDtypeStruct((B, N_PAD), jnp.float32),
        grid_spec=pltpu.PrefetchScalarGridSpec(
            num_scalar_prefetch=0,
            grid=(1,),  # full K in one step: whole working set (<200 KB) fits VMEM
            in_specs=[
                pl.BlockSpec((B, K), lambda i: (0, 0)),        # x (full)
                pl.BlockSpec((K, N_PAD), lambda i: (0, 0)),    # weight (full)
                pl.BlockSpec((1, N_PAD), lambda i: (0, 0)),    # bias
            ],
            out_specs=pl.BlockSpec((B, N_PAD), lambda i: (0, 0)),
        ),
        compiler_params=pltpu.CompilerParams(
            dimension_semantics=("arbitrary",),
        ),
    )(x_bf16, w_t, b_pad)

    return out_pad[:, :OUT_FEATURES]


def init_params(key):
    """Deterministic init matching the PyTorch module:
    kaiming_uniform_ on weight (a=0, fan_in mode -> bound = sqrt(6/fan_in)),
    bias filled with 0."""
    fan_in = IN_FEATURES
    bound = (6.0 / fan_in) ** 0.5
    weight = jax.random.uniform(
        key, (OUT_FEATURES, IN_FEATURES), dtype=jnp.float32,
        minval=-bound, maxval=bound,
    )
    bias = jnp.zeros((OUT_FEATURES,), dtype=jnp.float32)
    return weight, bias


if __name__ == "__main__":
    key = jax.random.PRNGKey(0)
    k_w, k_x = jax.random.split(key)

    weight, bias = init_params(k_w)
    # Prepare the transposed/padded bf16 weight ONCE (hoisted out of the forward).
    w_t, b_pad = prepare_params(weight, bias)

    B = 2
    x = jax.random.normal(k_x, (B, IN_FEATURES), dtype=jnp.float32)

    forward = jax.jit(classifier_forward)
    out = forward(x, w_t, b_pad)
    out = jax.block_until_ready(out)

    assert out.shape == (B, OUT_FEATURES)

    # Reference at the same bf16 input precision (tight check on the kernel math).
    ref_bf16 = (
        x.astype(jnp.bfloat16).astype(jnp.float32)
        @ weight.T.astype(jnp.bfloat16).astype(jnp.float32)
        + bias
    )
    assert jnp.allclose(out, ref_bf16, atol=1e-3, rtol=1e-3)

    # Loose sanity check against the pure-f32 PyTorch-equivalent math.
    ref_f32 = x @ weight.T + bias
    assert jnp.allclose(out, ref_f32, atol=1e-1, rtol=1e-1)

    print("KERNEL_OK")
</pallas_src>

<mosaic_0001>
module attributes {stable_mosaic.version = 11 : i64} {
  func.func @linear_kernel(%arg0: i32, %arg1: memref<2x6272xbf16, #tpu.memory_space<vmem>>, %arg2: memref<6272x8xbf16, #tpu.memory_space<vmem>>, %arg3: memref<1x8xf32, #tpu.memory_space<vmem>>, %arg4: memref<2x8xf32, #tpu.memory_space<vmem>>) attributes {dimension_semantics = [#tpu.dimension_semantics<arbitrary>], iteration_bounds = array<i64: 1>, scalar_prefetch = 0 : i64, scratch_operands = 0 : i64, tpu.core_type = #tpu.core_type<tc>, window_params = [{pipeline_mode = #tpu.pipeline_mode<synchronous>, transform_indices = @transform_0, window_bounds = array<i64: 2, 6272>}, {pipeline_mode = #tpu.pipeline_mode<synchronous>, transform_indices = @transform_1, window_bounds = array<i64: 6272, 8>}, {pipeline_mode = #tpu.pipeline_mode<synchronous>, transform_indices = @transform_2, window_bounds = array<i64: 1, 8>}, {pipeline_mode = #tpu.pipeline_mode<synchronous>, transform_indices = @transform_3, window_bounds = array<i64: 2, 8>}]} {
    %c0 = arith.constant 0 : index
    %c0_0 = arith.constant 0 : index
    %0 = vector.load %arg1[%c0, %c0_0] : memref<2x6272xbf16, #tpu.memory_space<vmem>>, vector<2x6272xbf16>
    %c0_1 = arith.constant 0 : index
    %c0_2 = arith.constant 0 : index
    %1 = vector.load %arg2[%c0_1, %c0_2] : memref<6272x8xbf16, #tpu.memory_space<vmem>>, vector<6272x8xbf16>
    %cst = arith.constant dense<0.000000e+00> : vector<2x8xf32>
    %2 = tpu.matmul %0, %1, %cst {dimension_numbers = #tpu.dot_dimension_numbers<[1], [0], [0], [1], [0, 0, 1, 1], [], []>} : vector<2x6272xbf16>, vector<6272x8xbf16>, vector<2x8xf32> -> vector<2x8xf32>
    %c0_3 = arith.constant 0 : index
    %c0_4 = arith.constant 0 : index
    %3 = vector.load %arg3[%c0_3, %c0_4] : memref<1x8xf32, #tpu.memory_space<vmem>>, vector<1x8xf32>
    %4 = vector.broadcast %3 : vector<1x8xf32> to vector<2x8xf32>
    %5 = arith.addf %2, %4 : vector<2x8xf32>
    %c0_5 = arith.constant 0 : index
    %c0_6 = arith.constant 0 : index
    %6 = vector.load %arg4[%c0_5, %c0_6] : memref<2x8xf32, #tpu.memory_space<vmem>>, vector<2x8xf32>
    tpu.vector_store %arg4[%c0_5, %c0_6], %5 {strides = array<i32>} : memref<2x8xf32, #tpu.memory_space<vmem>>, vector<2x8xf32>,
    return
  }
  func.func @transform_0(%arg0: i32) -> (i32, i32) {
    %c0_i32 = arith.constant 0 : i32
    %c0_i32_0 = arith.constant 0 : i32
    %c0_i32_1 = arith.constant 0 : i32
    return %c0_i32, %c0_i32_0 : i32, i32
  }
  func.func @transform_1(%arg0: i32) -> (i32, i32) {
    %c0_i32 = arith.constant 0 : i32
    %c0_i32_0 = arith.constant 0 : i32
    %c0_i32_1 = arith.constant 0 : i32
    return %c0_i32, %c0_i32_0 : i32, i32
  }
  func.func @transform_2(%arg0: i32) -> (i32, i32) {
    %c0_i32 = arith.constant 0 : i32
    %c0_i32_0 = arith.constant 0 : i32
    %c0_i32_1 = arith.constant 0 : i32
    return %c0_i32, %c0_i32_0 : i32, i32
  }
  func.func @transform_3(%arg0: i32) -> (i32, i32) {
    %c0_i32 = arith.constant 0 : i32
    %c0_i32_0 = arith.constant 0 : i32
    %c0_i32_1 = arith.constant 0 : i32
    return %c0_i32, %c0_i32_0 : i32, i32
  }
}

</mosaic_0001>

<bundles_post_ra>
// kernel: classifier_forward.1
= control target key start
LH: loop header
LB: loop body
LE: loop exit
PB: predicated region body
PF: predicated region fallthrough
CT: control target
= control target key end

     0   :  { %v825_v27 = vlaneseq  ;;  %v5921_v35 = vmov 1966171168   ;;  %s7232_s0 = inlined_call_operand.vmem [shape: bf16[2,6272], index: 0, kind: input, shape index: {}]   ;;  %s7233_s1 = inlined_call_operand.vmem [shape: bf16[6272,8], index: 1, kind: input, shape index: {}]   ;;  %s7234_s2 = inlined_call_operand.vmem [shape: f32[1,8], index: 2, kind: input, shape index: {}]   ;;  %s7235_s3 = inlined_call_operand.hbm [shape: f32[2,8], index: 3, kind: output, shape index: {}]  }
   0x1   :  { %v5501_v0 = vld [vmem:[%s7233_s1 + $0x78] sm:$0xff]   ;;  %v5505_v4 = vld [vmem:[%s7233_s1 + $0x70] sm:$0xff]   ;;  %v5509_v8 = vld [vmem:[%s7233_s1 + $0x68] sm:$0xff]   ;;  %v823_v36 = vunpack.c.l.s4 %v5921_v35 }
   0x2   :  { %v5502_v1 = vld [vmem:[%s7233_s1 + $0x38] sm:$0xff]   ;;  %4940 = vmatprep.subr.bf16.mxu0 %v5501_v0  ;;  %v5506_v5 = vld [vmem:[%s7233_s1 + $0x30] sm:$0xff]   ;;  %v5510_v9 = vld [vmem:[%s7233_s1 + $0x28] sm:$0xff]   ;;  %v826_v32 = vshrl.u32 %v825_v27, 7 }
   0x3   :  { %v5503_v2 = vld [vmem:[%s7233_s1 + $0xf8] sm:$0xff]   ;;  %4941 = vmatpush3.bf16.msra.mxu0 %v5502_v1  ;;  %v5507_v6 = vld [vmem:[%s7233_s1 + $0xf0] sm:$0xff]   ;;  %v5511_v10 = vld [vmem:[%s7233_s1 + $0xe8] sm:$0xff]   ;;  %v824_v39 = vunpack.c.0.s8 %v823_v36 }
   0x4   :  { %v5504_v3 = vld [vmem:[%s7233_s1 + $0xb8] sm:$0xff]   ;;  %4962 = vmatprep.subr.bf16.mxu1 %v5503_v2  ;;  %4942 = vmatprep.subr.bf16.mxu0 %v5505_v4  ;;  %v5508_v7 = vld [vmem:[%s7233_s1 + $0xb0] sm:$0xff]   ;;  %v5512_v11 = vld [vmem:[%s7233_s1 + $0xa8] sm:$0xff]  }
   0x5   :  { %4963 = vmatpush3.bf16.msra.mxu1 %v5504_v3  ;;  %v5513_v12 = vld [vmem:[%s7233_s1 + $0x60] sm:$0xff]   ;;  %v5517_v16 = vld [vmem:[%s7233_s1 + $0x58] sm:$0xff]   ;;  %v5521_v20 = vld [vmem:[%s7233_s1 + $0x50] sm:$0xff]   ;;  %v6050_v41 = vsub.s32 %v824_v39, %v826_v32 }
   0x6   :  { %4964 = vmatprep.subr.bf16.mxu1 %v5507_v6  ;;  %v5514_v13 = vld [vmem:[%s7233_s1 + $0x20] sm:$0xff]   ;;  %v5518_v17 = vld [vmem:[%s7233_s1 + $0x18] sm:$0xff]   ;;  %v5522_v21 = vld [vmem:[%s7233_s1 + $0x10] sm:$0xff]  }
   0x7   :  { %4943 = vmatpush3.bf16.msra.mxu0 %v5506_v5  ;;  %v5515_v14 = vld [vmem:[%s7233_s1 + $0xe0] sm:$0xff]   ;;  %v5519_v18 = vld [vmem:[%s7233_s1 + $0xd8] sm:$0xff]   ;;  %v5523_v22 = vld [vmem:[%s7233_s1 + $0xd0] sm:$0xff]  }
   0x8   :  { %4944 = vmatprep.subr.bf16.mxu0 %v5509_v8  ;;  %v5516_v15 = vld [vmem:[%s7233_s1 + $0xa0] sm:$0xff]   ;;  %v5520_v19 = vld [vmem:[%s7233_s1 + $0x98] sm:$0xff]   ;;  %v5524_v23 = vld [vmem:[%s7233_s1 + $0x90] sm:$0xff]  }
   0x9   :  { %4965 = vmatpush3.bf16.msra.mxu1 %v5508_v7  ;;  %v5525_v24 = vld [vmem:[%s7233_s1 + $0x48] sm:$0xff]   ;;  %v5529_v29 = vld [vmem:[%s7233_s1 + $0x40] sm:$0xff]   ;;  %v5534_v37 = vld [vmem:[%s7233_s1 + $0x178] sm:$0xff]  }
   0xa   :  { %4966 = vmatprep.subr.bf16.mxu1 %v5511_v10  ;;  %v5526_v25 = vld [vmem:[%s7233_s1 + $0x8] sm:$0xff]   ;;  %v5530_v30 = vld [vmem:[%s7233_s1] sm:$0xff]   ;;  %v5536_v40 = vld [vmem:[%s7233_s1 + $0x1f8] sm:$0xff]  }
   0xb   :  { %4945 = vmatpush3.bf16.msra.mxu0 %v5510_v9  ;;  %v5527_v26 = vld [vmem:[%s7233_s1 + $0xc8] sm:$0xff]   ;;  %v5531_v31 = vld [vmem:[%s7233_s1 + $0xc0] sm:$0xff]   ;;  %v5535_v47 = vld [vmem:[%s7233_s1 + $0x138] sm:$0xff]  }
   0xc   :  { %4946 = vmatprep.subr.bf16.mxu0 %v5513_v12  ;;  %v5528_v28 = vld [vmem:[%s7233_s1 + $0x88] sm:$0xff]   ;;  %v16_v33 = vld [vmem:[%s7232_s0] sm:$0xff]  ;;  %v5537_v49 = vld [vmem:[%s7233_s1 + $0x1b8] sm:$0xff]  }
   0xd   :  { %4967 = vmatpush3.bf16.msra.mxu1 %v5512_v11  ;;  %v5533_v34 = vld [vmem:[%s7233_s1 + $0x80] sm:$0xff]   ;;  %v821_v38 = vcombine.high %v16_v33, %v16_v33  ;;  %v828_v42 = vrot.slane %v16_v33, %v6050_v41  ;;  %v5538_v52 = vld [vmem:[%s7233_s1 + $0x170] sm:$0xff]   ;;  %v5542_v58 = vld [vmem:[%s7233_s1 + $0x168] sm:$0xff]  }
   0xe   :  { %4968 = vmatprep.subr.bf16.mxu1 %v5515_v14  ;;  %v5539_v54 = vld [vmem:[%s7233_s1 + $0x130] sm:$0xff]   ;;  %v5543_v59 = vld [vmem:[%s7233_s1 + $0x128] sm:$0xff]   ;;  %v5546_v62 = vld [vmem:[%s7233_s1 + $0x160] sm:$0xff]  }
   0xf   :  { %4947 = vmatpush3.bf16.msra.mxu0 %v5514_v13  ;;  %v6054_v43 = vrot.slane %v821_v38, %v6050_v41  ;;  %v836_v44 = vcombine.high %v828_v42, %v828_v42  ;;  %v844_v45 = vrot.slane %v828_v42, %v6050_v41  ;;  %v5540_v55 = vld [vmem:[%s7233_s1 + $0x1f0] sm:$0xff]   ;;  %v5544_v60 = vld [vmem:[%s7233_s1 + $0x1e8] sm:$0xff]   ;;  %v5547_v63 = vld [vmem:[%s7233_s1 + $0x120] sm:$0xff]  }
  0x10   :  { %4948 = vmatprep.subr.bf16.mxu0 %v5517_v16  ;;  %v5541_v57 = vld [vmem:[%s7233_s1 + $0x1b0] sm:$0xff]   ;;  %v5545_v61 = vld [vmem:[%s7233_s1 + $0x1a8] sm:$0xff]   ;;  %v5548_v0 = vld [vmem:[%s7233_s1 + $0x1e0] sm:$0xff]  }
  0x11   :  { %4969 = vmatpush3.bf16.msra.mxu1 %v5516_v15  ;;  %v837_v46 = vcombine.high %v6054_v43, %v6054_v43  ;;  %v858_v48 = vrot.slane %v836_v44, %v6050_v41  ;;  %v866_v51 = vcombine.high %v844_v45, %v844_v45  ;;  %v5549_v1 = vld [vmem:[%s7233_s1 + $0x1a0] sm:$0xff]   ;;  %v5550_v2 = vld [vmem:[%s7233_s1 + $0x158] sm:$0xff]   ;;  %v5554_v6 = vld [vmem:[%s7233_s1 + $0x150] sm:$0xff]  }
  0x12   :  { %4970 = vmatprep.subr.bf16.mxu1 %v5519_v18  ;;  %v5551_v3 = vld [vmem:[%s7233_s1 + $0x118] sm:$0xff]   ;;  %v5555_v7 = vld [vmem:[%s7233_s1 + $0x110] sm:$0xff]   ;;  %v5558_v10 = vld [vmem:[%s7233_s1 + $0x148] sm:$0xff]   ;;  %v851_v18 = vrot.slane %v6054_v43, %v6050_v41 }
  0x13   :  { %4949 = vmatpush3.bf16.msra.mxu0 %v5518_v17  ;;  %v865_v50 = vrot.slane %v837_v46, %v6050_v41  ;;  %3562 = vmatprep.mubr.bf16.mxu0 %v858_v48  ;;  %v868_v53 = vcombine.high %v858_v48, %v858_v48  ;;  %v5552_v4 = vld [vmem:[%s7233_s1 + $0x1d8] sm:$0xff]   ;;  %v5556_v8 = vld [vmem:[%s7233_s1 + $0x1d0] sm:$0xff]   ;;  %v5559_v11 = vld [vmem:[%s7233_s1 + $0x108] sm:$0xff]  }
  0x14   :  { %4950 = vmatprep.subr.bf16.mxu0 %v5521_v20  ;;  %v5553_v5 = vld [vmem:[%s7233_s1 + $0x198] sm:$0xff]   ;;  %v5557_v9 = vld [vmem:[%s7233_s1 + $0x190] sm:$0xff]   ;;  %v5560_v12 = vld [vmem:[%s7233_s1 + $0x1c8] sm:$0xff]  }
  0x15   :  { %4971 = vmatpush3.bf16.msra.mxu1 %v5520_v19  ;;  %v869_v56 = vcombine.high %v865_v50, %v865_v50  ;;  %3602 = vmatprep.mubr.bf16.mxu1 %v868_v53  ;;  %v5561_v13 = vld [vmem:[%s7233_s1 + $0x188] sm:$0xff]   ;;  %v5562_v14 = vld [vmem:[%s7233_s1 + $0x140] sm:$0xff]   ;;  %v5566_v19 = vld [vmem:[%s7233_s1 + $0x278] sm:$0xff]  }
  0x16   :  { %4972 = vmatprep.subr.bf16.mxu1 %v5523_v22  ;;  %v5563_v15 = vld [vmem:[%s7233_s1 + $0x100] sm:$0xff]   ;;  %v5567_v20 = vld [vmem:[%s7233_s1 + $0x238] sm:$0xff]   ;;  %v5573_v27 = vld [vmem:[%s7233_s1 + $0x2b0] sm:$0xff]  }
  0x17   :  { %4951 = vmatpush3.bf16.msra.mxu0 %v5522_v21  ;;  %v5564_v16 = vld [vmem:[%s7233_s1 + $0x1c0] sm:$0xff]   ;;  %v5568_v21 = vld [vmem:[%s7233_s1 + $0x2f8] sm:$0xff]   ;;  %v5587_v42 = vld [vmem:[%s7233_s1 + $0x210] sm:$0xff]  }
  0x18   :  { %4952 = vmatprep.subr.bf16.mxu0 %v5525_v24  ;;  %v5565_v17 = vld [vmem:[%s7233_s1 + $0x180] sm:$0xff]   ;;  %v5569_v22 = vld [vmem:[%s7233_s1 + $0x2b8] sm:$0xff]   ;;  %v5570_v24 = vld [vmem:[%s7233_s1 + $0x270] sm:$0xff]  }
  0x19   :  { %4973 = vmatpush3.bf16.msra.mxu1 %v5524_v23  ;;  %v867_v23 = vcombine.high %v851_v18, %v851_v18  ;;  %v5578_v32 = vld [vmem:[%s7233_s1 + $0x260] sm:$0xff]   ;;  %v5582_v36 = vld [vmem:[%s7233_s1 + $0x258] sm:$0xff]   ;;  %v5588_v43 = vld [vmem:[%s7233_s1 + $0x2d0] sm:$0xff]  }
  0x1a   :  { %4974 = vmatprep.subr.bf16.mxu1 %v5527_v26  ;;  %v5572_v26 = vld [vmem:[%s7233_s1 + $0x2f0] sm:$0xff]   ;;  %v5579_v33 = vld [vmem:[%s7233_s1 + $0x220] sm:$0xff]   ;;  %v5584_v38 = vld [vmem:[%s7233_s1 + $0x2d8] sm:$0xff]  }
  0x1b   :  { %4953 = vmatpush3.bf16.msra.mxu0 %v5526_v25  ;;  %v5571_v25 = vld [vmem:[%s7233_s1 + $0x230] sm:$0xff]   ;;  %v5581_v35 = vld [vmem:[%s7233_s1 + $0x2a0] sm:$0xff]   ;;  %v5585_v39 = vld [vmem:[%s7233_s1 + $0x298] sm:$0xff]  }
  0x1c   :  { %4954 = vmatprep.subr.bf16.mxu0 %v5529_v29  ;;  %v5575_v29 = vld [vmem:[%s7233_s1 + $0x228] sm:$0xff]   ;;  %v5589_v44 = vld [vmem:[%s7233_s1 + $0x290] sm:$0xff]  }
  0x1d   :  { %4975 = vmatpush3.bf16.msra.mxu1 %v5528_v28  ;;  %v5574_v28 = vld [vmem:[%s7233_s1 + $0x268] sm:$0xff]  }
  0x1e   :  { %4976 = vmatprep.subr.bf16.mxu1 %v5531_v31  ;;  %v5577_v31 = vld [vmem:[%s7233_s1 + $0x2a8] sm:$0xff]  }
  0x1f   :  { %4955 = vmatpush3.bf16.msra.mxu0 %v5530_v30  ;;  %v5576_v30 = vld [vmem:[%s7233_s1 + $0x2e8] sm:$0xff]  }
  0x20   :  { %4984 = vmatprep.subr.bf16.mxu0 %v5534_v37  ;;  %v5583_v37 = vld [vmem:[%s7233_s1 + $0x218] sm:$0xff]   ;;  %v17_v46 = vld [vmem:[%s7232_s0 + $0x8] sm:$0xff] }
  0x21   :  { %4977 = vmatpush3.bf16.msra.mxu1 %v5533_v34  ;;  %v5580_v34 = vld [vmem:[%s7233_s1 + $0x2e0] sm:$0xff]   ;;  %v877_v48 = vrot.slane %v17_v46, %v6050_v41 }
  0x22   :  { %5006 = vmatprep.subr.bf16.mxu1 %v5536_v40  ;;  %3563 = vmatmul.mubr.bf16.vlgmr.msra.gmra.mxu0 %v844_v45  ;;  %v5586_v40 = vld [vmem:[%s7233_s1 + $0x250] sm:$0xff]   ;;  %v5590_v45 = vld [vmem:[%s7233_s1 + $0x248] sm:$0xff]  }
  0x23   :  { %4985 = vmatpush3.bf16.msra.mxu0 %v5535_v47  ;;  %3642 = vmatprep.mubr.bf16.mxu0 %v865_v50  ;;  %v5591_v47 = vld [vmem:[%s7233_s1 + $0x208] sm:$0xff]  }
  0x24   :  { %3603 = vmatmul.mubr.bf16.vlgmr.msra.gmra.mxu1 %v866_v51  ;;  %4986 = vmatprep.subr.bf16.mxu0 %v5538_v52  ;;  %v5592_v50 = vld [vmem:[%s7233_s1 + $0x2c8] sm:$0xff]   ;;  %v885_v52 = vcombine.high %v877_v48, %v877_v48 }
  0x25   :  { %5007 = vmatpush3.bf16.msra.mxu1 %v5537_v49  ;;  %3682 = vmatprep.mubr.bf16.mxu1 %v869_v56  ;;  %v870_v49 = vcombine.high %v17_v46, %v17_v46  ;;  %v5593_v51 = vld [vmem:[%s7233_s1 + $0x288] sm:$0xff]  }
  0x26   :  { %5008 = vmatprep.subr.bf16.mxu1 %v5540_v55  ;;  %v5595_v55 = vld [vmem:[%s7233_s1 + $0x200] sm:$0xff]   ;;  %v907_v56 = vrot.slane %v885_v52, %v6050_v41  ;;  %v5641_v46 = vld [vmem:[%s7233_s1 + $0x4e8] sm:$0xff]   ;;  %v5647_v52 = vld [vmem:[%s7233_s1 + $0x458] sm:$0xff]  }
  0x27   :  { %4987 = vmatpush3.bf16.msra.mxu0 %v5539_v54  ;;  %v6242_v53 = vrot.slane %v870_v49, %v6050_v41  ;;  %v5594_v54 = vld [vmem:[%s7233_s1 + $0x240] sm:$0xff]  }
  0x28   :  { %4988 = vmatprep.subr.bf16.mxu0 %v5542_v58  ;;  %v5596_v58 = vld [vmem:[%s7233_s1 + $0x2c0] sm:$0xff]  }
  0x29   :  { %5009 = vmatpush3.bf16.msra.mxu1 %v5541_v57  ;;  %v886_v57 = vcombine.high %v6242_v53, %v6242_v53  ;;  %v5644_v49 = vld [vmem:[%s7233_s1 + $0x420] sm:$0xff]  }
  0x2a   :  { %5010 = vmatprep.subr.bf16.mxu1 %v5544_v60  ;;  %v917_v60 = vcombine.high %v907_v56, %v907_v56 }
  0x2b   :  { %4989 = vmatpush3.bf16.msra.mxu0 %v5543_v59  ;;  %v5597_v59 = vld [vmem:[%s7233_s1 + $0x280] sm:$0xff]  }
  0x2c   :  { %4990 = vmatprep.subr.bf16.mxu0 %v5546_v62  ;;  %v5598_v62 = vld [vmem:[%s7233_s1 + $0x378] sm:$0xff]  }
  0x2d   :  { %5011 = vmatpush3.bf16.msra.mxu1 %v5545_v61  ;;  %v893_v61 = vrot.slane %v877_v48, %v6050_v41  ;;  %v5643_v48 = vld [vmem:[%s7233_s1 + $0x460] sm:$0xff]  }
  0x2e   :  { %5012 = vmatprep.subr.bf16.mxu1 %v5548_v0  ;;  %v914_v0 = vrot.slane %v886_v57, %v6050_v41  ;;  %v5652_v57 = vld [vmem:[%s7233_s1 + $0x410] sm:$0xff]  }
  0x2f   :  { %4991 = vmatpush3.bf16.msra.mxu0 %v5547_v63  ;;  %v5599_v63 = vld [vmem:[%s7233_s1 + $0x338] sm:$0xff]  }
  0x30   :  { %4992 = vmatprep.subr.bf16.mxu0 %v5550_v2  ;;  %v5601_v2 = vld [vmem:[%s7233_s1 + $0x3b8] sm:$0xff]  }
  0x31   :  { %5013 = vmatpush3.bf16.msra.mxu1 %v5549_v1  ;;  %v5600_v1 = vld [vmem:[%s7233_s1 + $0x3f8] sm:$0xff]  }
  0x32   :  { %5014 = vmatprep.subr.bf16.mxu1 %v5552_v4  ;;  %v5602_v4 = vld [vmem:[%s7233_s1 + $0x370] sm:$0xff]  }
  0x33   :  { %4993 = vmatpush3.bf16.msra.mxu0 %v5551_v3  ;;  %v915_v3 = vcombine.high %v893_v61, %v893_v61 }
  0x34   :  { %4994 = vmatprep.subr.bf16.mxu0 %v5554_v6  ;;  %v918_v6 = vcombine.high %v914_v0, %v914_v0 }
  0x35   :  { %5015 = vmatpush3.bf16.msra.mxu1 %v5553_v5  ;;  %v5603_v5 = vld [vmem:[%s7233_s1 + $0x330] sm:$0xff]  }
  0x36   :  { %5016 = vmatprep.subr.bf16.mxu1 %v5556_v8  ;;  %v5605_v8 = vld [vmem:[%s7233_s1 + $0x3b0] sm:$0xff]  }
  0x37   :  { %4995 = vmatpush3.bf16.msra.mxu0 %v5555_v7  ;;  %v5604_v7 = vld [vmem:[%s7233_s1 + $0x3f0] sm:$0xff]  }
  0x38   :  { %4996 = vmatprep.subr.bf16.mxu0 %v5558_v10  ;;  %v5607_v10 = vld [vmem:[%s7233_s1 + $0x328] sm:$0xff]  }
  0x39   :  { %5017 = vmatpush3.bf16.msra.mxu1 %v5557_v9  ;;  %v5606_v9 = vld [vmem:[%s7233_s1 + $0x368] sm:$0xff]  }
  0x3a   :  { %5018 = vmatprep.subr.bf16.mxu1 %v5560_v12  ;;  %v5609_v12 = vld [vmem:[%s7233_s1 + $0x3a8] sm:$0xff]  }
  0x3b   :  { %4997 = vmatpush3.bf16.msra.mxu0 %v5559_v11  ;;  %v5608_v11 = vld [vmem:[%s7233_s1 + $0x3e8] sm:$0xff]  }
  0x3c   :  { %4998 = vmatprep.subr.bf16.mxu0 %v5562_v14  ;;  %v5611_v14 = vld [vmem:[%s7233_s1 + $0x320] sm:$0xff]  }
  0x3d   :  { %5019 = vmatpush3.bf16.msra.mxu1 %v5561_v13  ;;  %v5610_v13 = vld [vmem:[%s7233_s1 + $0x360] sm:$0xff]  }
  0x3e   :  { %5020 = vmatprep.subr.bf16.mxu1 %v5564_v16  ;;  %v5613_v16 = vld [vmem:[%s7233_s1 + $0x3a0] sm:$0xff]  }
  0x3f   :  { %4999 = vmatpush3.bf16.msra.mxu0 %v5563_v15  ;;  %v5612_v15 = vld [vmem:[%s7233_s1 + $0x3e0] sm:$0xff]  }
  0x40   :  { %5028 = vmatprep.subr.bf16.mxu0 %v5566_v19  ;;  %v5616_v19 = vld [vmem:[%s7233_s1 + $0x3d8] sm:$0xff]  }
  0x41   :  { %5021 = vmatpush3.bf16.msra.mxu1 %v5565_v17  ;;  %v5614_v17 = vld [vmem:[%s7233_s1 + $0x358] sm:$0xff]  }
  0x42   :  { %3643 = vmatmul.mubr.bf16.vlgmr.msra.gmra.mxu0 %v851_v18  ;;  %5050 = vmatprep.subr.bf16.mxu1 %v5568_v21  ;;  %v5615_v18 = vld [vmem:[%s7233_s1 + $0x318] sm:$0xff]   ;;  %v5618_v21 = vld [vmem:[%s7233_s1 + $0x350] sm:$0xff]  }
  0x43   :  { %5029 = vmatpush3.bf16.msra.mxu0 %v5567_v20  ;;  %3722 = vmatprep.mubr.bf16.mxu0 %v907_v56  ;;  %v5617_v20 = vld [vmem:[%s7233_s1 + $0x398] sm:$0xff]   ;;  %v5651_v56 = vld [vmem:[%s7233_s1 + $0x450] sm:$0xff]  }
  0x44   :  { %3683 = vmatmul.mubr.bf16.vlgmr.msra.gmra.mxu1 %v867_v23  ;;  %5030 = vmatprep.subr.bf16.mxu0 %v5570_v24  ;;  %v5620_v23 = vld [vmem:[%s7233_s1 + $0x3d0] sm:$0xff]  }
  0x45   :  { %5051 = vmatpush3.bf16.msra.mxu1 %v5569_v22  ;;  %3762 = vmatprep.mubr.bf16.mxu1 %v917_v60  ;;  %v5619_v22 = vld [vmem:[%s7233_s1 + $0x310] sm:$0xff]   ;;  %v5655_v60 = vld [vmem:[%s7233_s1 + $0x448] sm:$0xff]  }
  0x46   :  { %5052 = vmatprep.subr.bf16.mxu1 %v5572_v26  ;;  %v5621_v24 = vld [vmem:[%s7233_s1 + $0x390] sm:$0xff]   ;;  %v5623_v26 = vld [vmem:[%s7233_s1 + $0x308] sm:$0xff]  }
  0x47   :  { %5031 = vmatpush3.bf16.msra.mxu0 %v5571_v25  ;;  %v5622_v25 = vld [vmem:[%s7233_s1 + $0x348] sm:$0xff]  }
  0x48   :  { %5032 = vmatprep.subr.bf16.mxu0 %v5574_v28  ;;  %v5625_v28 = vld [vmem:[%s7233_s1 + $0x388] sm:$0xff]  }
  0x49   :  { %5053 = vmatpush3.bf16.msra.mxu1 %v5573_v27  ;;  %v5624_v27 = vld [vmem:[%s7233_s1 + $0x3c8] sm:$0xff]  }
  0x4a   :  { %5054 = vmatprep.subr.bf16.mxu1 %v5576_v30  ;;  %v5627_v30 = vld [vmem:[%s7233_s1 + $0x300] sm:$0xff]  }
  0x4b   :  { %5033 = vmatpush3.bf16.msra.mxu0 %v5575_v29  ;;  %v5626_v29 = vld [vmem:[%s7233_s1 + $0x340] sm:$0xff]  }
  0x4c   :  { %5034 = vmatprep.subr.bf16.mxu0 %v5578_v32  ;;  %v5630_v32 = vld [vmem:[%s7233_s1 + $0x380] sm:$0xff]  }
  0x4d   :  { %5055 = vmatpush3.bf16.msra.mxu1 %v5577_v31  ;;  %v5628_v31 = vld [vmem:[%s7233_s1 + $0x3c0] sm:$0xff]  }
  0x4e   :  { %5056 = vmatprep.subr.bf16.mxu1 %v5580_v34  ;;  %v5631_v34 = vld [vmem:[%s7233_s1 + $0x478] sm:$0xff]  }
  0x4f   :  { %5035 = vmatpush3.bf16.msra.mxu0 %v5579_v33  ;;  %v900_v33 = vrot.slane %v6242_v53, %v6050_v41  ;;  %v5648_v53 = vld [vmem:[%s7233_s1 + $0x418] sm:$0xff]  }
  0x50   :  { %5036 = vmatprep.subr.bf16.mxu0 %v5582_v36  ;;  %v5633_v36 = vld [vmem:[%s7233_s1 + $0x4f8] sm:$0xff]  }
  0x51   :  { %5057 = vmatpush3.bf16.msra.mxu1 %v5581_v35  ;;  %v5632_v35 = vld [vmem:[%s7233_s1 + $0x438] sm:$0xff]  }
  0x52   :  { %5058 = vmatprep.subr.bf16.mxu1 %v5584_v38  ;;  %v916_v38 = vcombine.high %v900_v33, %v900_v33 }
  0x53   :  { %5037 = vmatpush3.bf16.msra.mxu0 %v5583_v37  ;;  %v5634_v37 = vld [vmem:[%s7233_s1 + $0x4b8] sm:$0xff]  }
  0x54   :  { %5038 = vmatprep.subr.bf16.mxu0 %v5586_v40  ;;  %v5636_v40 = vld [vmem:[%s7233_s1 + $0x430] sm:$0xff]  }
  0x55   :  { %5059 = vmatpush3.bf16.msra.mxu1 %v5585_v39  ;;  %v5635_v39 = vld [vmem:[%s7233_s1 + $0x470] sm:$0xff]  }
  0x56   :  { %5060 = vmatprep.subr.bf16.mxu1 %v5588_v43  ;;  %v5638_v43 = vld [vmem:[%s7233_s1 + $0x4b0] sm:$0xff]  }
  0x57   :  { %5039 = vmatpush3.bf16.msra.mxu0 %v5587_v42  ;;  %v5637_v42 = vld [vmem:[%s7233_s1 + $0x4f0] sm:$0xff]  }
  0x58   :  { %5040 = vmatprep.subr.bf16.mxu0 %v5590_v45  ;;  %v5640_v45 = vld [vmem:[%s7233_s1 + $0x428] sm:$0xff]  }
  0x59   :  { %5061 = vmatpush3.bf16.msra.mxu1 %v5589_v44  ;;  %v5639_v44 = vld [vmem:[%s7233_s1 + $0x468] sm:$0xff]  }
  0x5a   :  { %5062 = vmatprep.subr.bf16.mxu1 %v5592_v50  ;;  %v5645_v50 = vld [vmem:[%s7233_s1 + $0x4e0] sm:$0xff]  }
  0x5b   :  { %5041 = vmatpush3.bf16.msra.mxu0 %v5591_v47  ;;  %v5642_v47 = vld [vmem:[%s7233_s1 + $0x4a8] sm:$0xff]  }
  0x5c   :  { %5042 = vmatprep.subr.bf16.mxu0 %v5594_v54  ;;  %v5649_v54 = vld [vmem:[%s7233_s1 + $0x4d8] sm:$0xff]  }
  0x5d   :  { %5063 = vmatpush3.bf16.msra.mxu1 %v5593_v51  ;;  %v5646_v51 = vld [vmem:[%s7233_s1 + $0x4a0] sm:$0xff]  }
  0x5e   :  { %5064 = vmatprep.subr.bf16.mxu1 %v5596_v58  ;;  %v5653_v58 = vld [vmem:[%s7233_s1 + $0x4d0] sm:$0xff]  }
  0x5f   :  { %5043 = vmatpush3.bf16.msra.mxu0 %v5595_v55  ;;  %v5650_v55 = vld [vmem:[%s7233_s1 + $0x498] sm:$0xff]  }
  0x60   :  { %5072 = vmatprep.subr.bf16.mxu0 %v5598_v62  ;;  %v5656_v62 = vld [vmem:[%s7233_s1 + $0x408] sm:$0xff]  }
  0x61   :  { %5065 = vmatpush3.bf16.msra.mxu1 %v5597_v59  ;;  %v5654_v59 = vld [vmem:[%s7233_s1 + $0x490] sm:$0xff]  }
  0x62   :  { %3723 = vmatmul.mubr.bf16.vlgmr.msra.gmra.mxu0 %v893_v61  ;;  %5094 = vmatprep.subr.bf16.mxu1 %v5600_v1  ;;  %v18_v61 = vld [vmem:[%s7232_s0 + $0x10] sm:$0xff]  ;;  %v5657_v1 = vld [vmem:[%s7233_s1 + $0x4c8] sm:$0xff]  }
  0x63   :  { %5073 = vmatpush3.bf16.msra.mxu0 %v5599_v63  ;;  %3802 = vmatprep.mubr.bf16.mxu0 %v914_v0  ;;  %v926_v63 = vrot.slane %v18_v61, %v6050_v41  ;;  %v919_v0 = vcombine.high %v18_v61, %v18_v61  ;;  %v5706_v61 = vld [vmem:[%s7233_s1 + $0x6e8] sm:$0xff]  }
  0x64   :  { %3763 = vmatmul.mubr.bf16.vlgmr.msra.gmra.mxu1 %v915_v3  ;;  %5074 = vmatprep.subr.bf16.mxu0 %v5602_v4 }
  0x65   :  { %5095 = vmatpush3.bf16.msra.mxu1 %v5601_v2  ;;  %3842 = vmatprep.mubr.bf16.mxu1 %v918_v6  ;;  %v5658_v2 = vld [vmem:[%s7233_s1 + $0x488] sm:$0xff]   ;;  %v934_v3 = vcombine.high %v926_v63, %v926_v63  ;;  %v6448_v4 = vrot.slane %v919_v0, %v6050_v41  ;;  %v5660_v6 = vld [vmem:[%s7233_s1 + $0x400] sm:$0xff]  }
  0x66   :  { %5096 = vmatprep.subr.bf16.mxu1 %v5604_v7  ;;  %v5709_v0 = vld [vmem:[%s7233_s1 + $0x620] sm:$0xff]  }
  0x67   :  { %5075 = vmatpush3.bf16.msra.mxu0 %v5603_v5  ;;  %v5659_v5 = vld [vmem:[%s7233_s1 + $0x440] sm:$0xff]   ;;  %v956_v7 = vrot.slane %v934_v3, %v6050_v41  ;;  %v5712_v3 = vld [vmem:[%s7233_s1 + $0x658] sm:$0xff]  }
  0x68   :  { %5076 = vmatprep.subr.bf16.mxu0 %v5606_v9  ;;  %v5661_v9 = vld [vmem:[%s7233_s1 + $0x4c0] sm:$0xff]  }
  0x69   :  { %5097 = vmatpush3.bf16.msra.mxu1 %v5605_v8  ;;  %v935_v8 = vcombine.high %v6448_v4, %v6448_v4 }
  0x6a   :  { %5098 = vmatprep.subr.bf16.mxu1 %v5608_v11  ;;  %v966_v11 = vcombine.high %v956_v7, %v956_v7 }
  0x6b   :  { %5077 = vmatpush3.bf16.msra.mxu0 %v5607_v10  ;;  %v5662_v10 = vld [vmem:[%s7233_s1 + $0x480] sm:$0xff]  }
  0x6c   :  { %5078 = vmatprep.subr.bf16.mxu0 %v5610_v13  ;;  %v5663_v13 = vld [vmem:[%s7233_s1 + $0x578] sm:$0xff]  }
  0x6d   :  { %5099 = vmatpush3.bf16.msra.mxu1 %v5609_v12  ;;  %v942_v12 = vrot.slane %v926_v63, %v6050_v41  ;;  %v5708_v63 = vld [vmem:[%s7233_s1 + $0x660] sm:$0xff]  }
  0x6e   :  { %5100 = vmatprep.subr.bf16.mxu1 %v5612_v15  ;;  %v963_v15 = vrot.slane %v935_v8, %v6050_v41  ;;  %v5717_v8 = vld [vmem:[%s7233_s1 + $0x610] sm:$0xff]  }
  0x6f   :  { %5079 = vmatpush3.bf16.msra.mxu0 %v5611_v14  ;;  %v5664_v14 = vld [vmem:[%s7233_s1 + $0x538] sm:$0xff]  }
  0x70   :  { %5080 = vmatprep.subr.bf16.mxu0 %v5614_v17  ;;  %v5666_v17 = vld [vmem:[%s7233_s1 + $0x5b8] sm:$0xff]  }
  0x71   :  { %5101 = vmatpush3.bf16.msra.mxu1 %v5613_v16  ;;  %v5665_v16 = vld [vmem:[%s7233_s1 + $0x5f8] sm:$0xff]  }
  0x72   :  { %5102 = vmatprep.subr.bf16.mxu1 %v5616_v19  ;;  %v5667_v19 = vld [vmem:[%s7233_s1 + $0x570] sm:$0xff]  }
  0x73   :  { %5081 = vmatpush3.bf16.msra.mxu0 %v5615_v18  ;;  %v964_v18 = vcombine.high %v942_v12, %v942_v12 }
  0x74   :  { %5082 = vmatprep.subr.bf16.mxu0 %v5618_v21  ;;  %v967_v21 = vcombine.high %v963_v15, %v963_v15 }
  0x75   :  { %5103 = vmatpush3.bf16.msra.mxu1 %v5617_v20  ;;  %v5668_v20 = vld [vmem:[%s7233_s1 + $0x530] sm:$0xff]  }
  0x76   :  { %5104 = vmatprep.subr.bf16.mxu1 %v5620_v23  ;;  %v5670_v23 = vld [vmem:[%s7233_s1 + $0x5b0] sm:$0xff]  }
  0x77   :  { %5083 = vmatpush3.bf16.msra.mxu0 %v5619_v22  ;;  %v5669_v22 = vld [vmem:[%s7233_s1 + $0x5f0] sm:$0xff]  }
  0x78   :  { %5084 = vmatprep.subr.bf16.mxu0 %v5622_v25  ;;  %v5672_v25 = vld [vmem:[%s7233_s1 + $0x528] sm:$0xff]  }
  0x79   :  { %5105 = vmatpush3.bf16.msra.mxu1 %v5621_v24  ;;  %v5671_v24 = vld [vmem:[%s7233_s1 + $0x568] sm:$0xff]  }
  0x7a   :  { %5106 = vmatprep.subr.bf16.mxu1 %v5624_v27  ;;  %v5674_v27 = vld [vmem:[%s7233_s1 + $0x5a8] sm:$0xff]  }
  0x7b   :  { %5085 = vmatpush3.bf16.msra.mxu0 %v5623_v26  ;;  %v5673_v26 = vld [vmem:[%s7233_s1 + $0x5e8] sm:$0xff]  }
  0x7c   :  { %5086 = vmatprep.subr.bf16.mxu0 %v5626_v29  ;;  %v5676_v29 = vld [vmem:[%s7233_s1 + $0x520] sm:$0xff]  }
  0x7d   :  { %5107 = vmatpush3.bf16.msra.mxu1 %v5625_v28  ;;  %v5675_v28 = vld [vmem:[%s7233_s1 + $0x560] sm:$0xff]  }
  0x7e   :  { %5108 = vmatprep.subr.bf16.mxu1 %v5628_v31  ;;  %v5678_v31 = vld [vmem:[%s7233_s1 + $0x5a0] sm:$0xff]  }
  0x7f   :  { %5087 = vmatpush3.bf16.msra.mxu0 %v5627_v30  ;;  %v5677_v30 = vld [vmem:[%s7233_s1 + $0x5e0] sm:$0xff]  }
  0x80   :  { %5116 = vmatprep.subr.bf16.mxu0 %v5631_v34  ;;  %v5681_v34 = vld [vmem:[%s7233_s1 + $0x5d8] sm:$0xff]  }
  0x81   :  { %5109 = vmatpush3.bf16.msra.mxu1 %v5630_v32  ;;  %v5679_v32 = vld [vmem:[%s7233_s1 + $0x558] sm:$0xff]  }
  0x82   :  { %3803 = vmatmul.mubr.bf16.vlgmr.msra.gmra.mxu0 %v900_v33  ;;  %5138 = vmatprep.subr.bf16.mxu1 %v5633_v36  ;;  %v5680_v33 = vld [vmem:[%s7233_s1 + $0x518] sm:$0xff]   ;;  %v5683_v36 = vld [vmem:[%s7233_s1 + $0x550] sm:$0xff]  }
  0x83   :  { %5117 = vmatpush3.bf16.msra.mxu0 %v5632_v35  ;;  %3882 = vmatprep.mubr.bf16.mxu0 %v956_v7  ;;  %v5682_v35 = vld [vmem:[%s7233_s1 + $0x598] sm:$0xff]   ;;  %v5716_v7 = vld [vmem:[%s7233_s1 + $0x650] sm:$0xff]  }
  0x84   :  { %3843 = vmatmul.mubr.bf16.vlgmr.msra.gmra.mxu1 %v916_v38  ;;  %5118 = vmatprep.subr.bf16.mxu0 %v5635_v39  ;;  %v5685_v38 = vld [vmem:[%s7233_s1 + $0x5d0] sm:$0xff]  }
  0x85   :  { %5139 = vmatpush3.bf16.msra.mxu1 %v5634_v37  ;;  %3922 = vmatprep.mubr.bf16.mxu1 %v966_v11  ;;  %v5684_v37 = vld [vmem:[%s7233_s1 + $0x510] sm:$0xff]   ;;  %v5720_v11 = vld [vmem:[%s7233_s1 + $0x648] sm:$0xff]  }
  0x86   :  { %5140 = vmatprep.subr.bf16.mxu1 %v5637_v42  ;;  %v5686_v39 = vld [vmem:[%s7233_s1 + $0x590] sm:$0xff]   ;;  %v5688_v42 = vld [vmem:[%s7233_s1 + $0x508] sm:$0xff]  }
  0x87   :  { %5119 = vmatpush3.bf16.msra.mxu0 %v5636_v40  ;;  %v5687_v40 = vld [vmem:[%s7233_s1 + $0x548] sm:$0xff]  }
  0x88   :  { %5120 = vmatprep.subr.bf16.mxu0 %v5639_v44  ;;  %v5690_v44 = vld [vmem:[%s7233_s1 + $0x588] sm:$0xff]  }
  0x89   :  { %5141 = vmatpush3.bf16.msra.mxu1 %v5638_v43  ;;  %v5689_v43 = vld [vmem:[%s7233_s1 + $0x5c8] sm:$0xff]  }
  0x8a   :  { %5142 = vmatprep.subr.bf16.mxu1 %v5641_v46  ;;  %v5692_v46 = vld [vmem:[%s7233_s1 + $0x500] sm:$0xff]  }
  0x8b   :  { %5121 = vmatpush3.bf16.msra.mxu0 %v5640_v45  ;;  %v5691_v45 = vld [vmem:[%s7233_s1 + $0x540] sm:$0xff]  }
  0x8c   :  { %5122 = vmatprep.subr.bf16.mxu0 %v5643_v48  ;;  %v5695_v48 = vld [vmem:[%s7233_s1 + $0x580] sm:$0xff]  }
  0x8d   :  { %5143 = vmatpush3.bf16.msra.mxu1 %v5642_v47  ;;  %v5693_v47 = vld [vmem:[%s7233_s1 + $0x5c0] sm:$0xff]  }
  0x8e   :  { %5144 = vmatprep.subr.bf16.mxu1 %v5645_v50  ;;  %v5696_v50 = vld [vmem:[%s7233_s1 + $0x678] sm:$0xff]  }
  0x8f   :  { %5123 = vmatpush3.bf16.msra.mxu0 %v5644_v49  ;;  %v949_v49 = vrot.slane %v6448_v4, %v6050_v41  ;;  %v5713_v4 = vld [vmem:[%s7233_s1 + $0x618] sm:$0xff]  }
  0x90   :  { %5124 = vmatprep.subr.bf16.mxu0 %v5647_v52  ;;  %v5698_v52 = vld [vmem:[%s7233_s1 + $0x6f8] sm:$0xff]  }
  0x91   :  { %5145 = vmatpush3.bf16.msra.mxu1 %v5646_v51  ;;  %v5697_v51 = vld [vmem:[%s7233_s1 + $0x638] sm:$0xff]  }
  0x92   :  { %5146 = vmatprep.subr.bf16.mxu1 %v5649_v54  ;;  %v965_v54 = vcombine.high %v949_v49, %v949_v49 }
  0x93   :  { %5125 = vmatpush3.bf16.msra.mxu0 %v5648_v53  ;;  %v5699_v53 = vld [vmem:[%s7233_s1 + $0x6b8] sm:$0xff]  }
  0x94   :  { %5126 = vmatprep.subr.bf16.mxu0 %v5651_v56  ;;  %v5701_v56 = vld [vmem:[%s7233_s1 + $0x630] sm:$0xff]  }
  0x95   :  { %5147 = vmatpush3.bf16.msra.mxu1 %v5650_v55  ;;  %v5700_v55 = vld [vmem:[%s7233_s1 + $0x670] sm:$0xff]  }
  0x96   :  { %5148 = vmatprep.subr.bf16.mxu1 %v5653_v58  ;;  %v5703_v58 = vld [vmem:[%s7233_s1 + $0x6b0] sm:$0xff]  }
  0x97   :  { %5127 = vmatpush3.bf16.msra.mxu0 %v5652_v57  ;;  %v5702_v57 = vld [vmem:[%s7233_s1 + $0x6f0] sm:$0xff]  }
  0x98   :  { %5128 = vmatprep.subr.bf16.mxu0 %v5655_v60  ;;  %v5705_v60 = vld [vmem:[%s7233_s1 + $0x628] sm:$0xff]  }
  0x99   :  { %5149 = vmatpush3.bf16.msra.mxu1 %v5654_v59  ;;  %v5704_v59 = vld [vmem:[%s7233_s1 + $0x668] sm:$0xff]  }
  0x9a   :  { %5150 = vmatprep.subr.bf16.mxu1 %v5657_v1  ;;  %v5710_v1 = vld [vmem:[%s7233_s1 + $0x6e0] sm:$0xff]  }
  0x9b   :  { %5129 = vmatpush3.bf16.msra.mxu0 %v5656_v62  ;;  %v5707_v62 = vld [vmem:[%s7233_s1 + $0x6a8] sm:$0xff]  }
  0x9c   :  { %5130 = vmatprep.subr.bf16.mxu0 %v5659_v5  ;;  %v5714_v5 = vld [vmem:[%s7233_s1 + $0x6d8] sm:$0xff]  }
  0x9d   :  { %5151 = vmatpush3.bf16.msra.mxu1 %v5658_v2  ;;  %v5711_v2 = vld [vmem:[%s7233_s1 + $0x6a0] sm:$0xff]  }
  0x9e   :  { %5152 = vmatprep.subr.bf16.mxu1 %v5661_v9  ;;  %v5718_v9 = vld [vmem:[%s7233_s1 + $0x6d0] sm:$0xff]  }
  0x9f   :  { %5131 = vmatpush3.bf16.msra.mxu0 %v5660_v6  ;;  %v5715_v6 = vld [vmem:[%s7233_s1 + $0x698] sm:$0xff]  }
  0xa0   :  { %5160 = vmatprep.subr.bf16.mxu0 %v5663_v13  ;;  %v5722_v13 = vld [vmem:[%s7233_s1 + $0x6c8] sm:$0xff]  }
  0xa1   :  { %5153 = vmatpush3.bf16.msra.mxu1 %v5662_v10  ;;  %v5719_v10 = vld [vmem:[%s7233_s1 + $0x690] sm:$0xff]  }
  0xa2   :  { %3883 = vmatmul.mubr.bf16.vlgmr.msra.gmra.mxu0 %v942_v12  ;;  %5182 = vmatprep.subr.bf16.mxu1 %v5665_v16  ;;  %v19_v12 = vld [vmem:[%s7232_s0 + $0x18] sm:$0xff]  ;;  %v5721_v16 = vld [vmem:[%s7233_s1 + $0x608] sm:$0xff]  }
  0xa3   :  { %5161 = vmatpush3.bf16.msra.mxu0 %v5664_v14  ;;  %3962 = vmatprep.mubr.bf16.mxu0 %v963_v15  ;;  %v975_v14 = vrot.slane %v19_v12, %v6050_v41  ;;  %v968_v15 = vcombine.high %v19_v12, %v19_v12  ;;  %v5760_v12 = vld [vmem:[%s7233_s1 + $0x780] sm:$0xff]  }
  0xa4   :  { %3923 = vmatmul.mubr.bf16.vlgmr.msra.gmra.mxu1 %v964_v18  ;;  %5162 = vmatprep.subr.bf16.mxu0 %v5667_v19  ;;  %v5724_v18 = vld [vmem:[%s7233_s1 + $0x640] sm:$0xff]  }
  0xa5   :  { %5183 = vmatpush3.bf16.msra.mxu1 %v5666_v17  ;;  %4002 = vmatprep.mubr.bf16.mxu1 %v967_v21  ;;  %v5723_v17 = vld [vmem:[%s7233_s1 + $0x688] sm:$0xff]   ;;  %v983_v19 = vcombine.high %v975_v14, %v975_v14  ;;  %v5725_v21 = vld [vmem:[%s7233_s1 + $0x600] sm:$0xff]  }
  0xa6   :  { %5184 = vmatprep.subr.bf16.mxu1 %v5669_v22  ;;  %v5726_v22 = vld [vmem:[%s7233_s1 + $0x6c0] sm:$0xff]  }
  0xa7   :  { %5163 = vmatpush3.bf16.msra.mxu0 %v5668_v20  ;;  %v6657_v20 = vrot.slane %v968_v15, %v6050_v41  ;;  %v5762_v15 = vld [vmem:[%s7233_s1 + $0x838] sm:$0xff]  }
  0xa8   :  { %5164 = vmatprep.subr.bf16.mxu0 %v5671_v24 }
  0xa9   :  { %5185 = vmatpush3.bf16.msra.mxu1 %v5670_v23  ;;  %v1005_v23 = vrot.slane %v983_v19, %v6050_v41  ;;  %v984_v24 = vcombine.high %v6657_v20, %v6657_v20  ;;  %v5765_v19 = vld [vmem:[%s7233_s1 + $0x870] sm:$0xff]  }
  0xaa   :  { %5186 = vmatprep.subr.bf16.mxu1 %v5673_v26  ;;  %v991_v26 = vrot.slane %v975_v14, %v6050_v41  ;;  %v5761_v14 = vld [vmem:[%s7233_s1 + $0x878] sm:$0xff]  }
  0xab   :  { %5165 = vmatpush3.bf16.msra.mxu0 %v5672_v25  ;;  %v5727_v25 = vld [vmem:[%s7233_s1 + $0x680] sm:$0xff]  }
  0xac   :  { %5166 = vmatprep.subr.bf16.mxu0 %v5675_v28  ;;  %v1015_v28 = vcombine.high %v1005_v23, %v1005_v23 }
  0xad   :  { %5187 = vmatpush3.bf16.msra.mxu1 %v5674_v27  ;;  %v5728_v27 = vld [vmem:[%s7233_s1 + $0x778] sm:$0xff]  }
  0xae   :  { %5188 = vmatprep.subr.bf16.mxu1 %v5677_v30  ;;  %v1012_v30 = vrot.slane %v984_v24, %v6050_v41 }
  0xaf   :  { %5167 = vmatpush3.bf16.msra.mxu0 %v5676_v29  ;;  %v5729_v29 = vld [vmem:[%s7233_s1 + $0x738] sm:$0xff]  }
  0xb0   :  { %5168 = vmatprep.subr.bf16.mxu0 %v5679_v32  ;;  %v5731_v32 = vld [vmem:[%s7233_s1 + $0x7b8] sm:$0xff]  }
  0xb1   :  { %5189 = vmatpush3.bf16.msra.mxu1 %v5678_v31  ;;  %v5730_v31 = vld [vmem:[%s7233_s1 + $0x7f8] sm:$0xff]  }
  0xb2   :  { %5190 = vmatprep.subr.bf16.mxu1 %v5681_v34  ;;  %v5732_v34 = vld [vmem:[%s7233_s1 + $0x770] sm:$0xff]  }
  0xb3   :  { %5169 = vmatpush3.bf16.msra.mxu0 %v5680_v33  ;;  %v1013_v33 = vcombine.high %v991_v26, %v991_v26 }
  0xb4   :  { %5170 = vmatprep.subr.bf16.mxu0 %v5683_v36  ;;  %v1016_v36 = vcombine.high %v1012_v30, %v1012_v30 }
  0xb5   :  { %5191 = vmatpush3.bf16.msra.mxu1 %v5682_v35  ;;  %v5733_v35 = vld [vmem:[%s7233_s1 + $0x730] sm:$0xff]  }
  0xb6   :  { %5192 = vmatprep.subr.bf16.mxu1 %v5685_v38  ;;  %v4546_v38 = vld [vmem:[%s7234_s2] ss:$0 sm:$0xff] }
  0xb7   :  { %5171 = vmatpush3.bf16.msra.mxu0 %v5684_v37 }
  0xb8   :  { %5172 = vmatprep.subr.bf16.mxu0 %v5687_v40  ;;  %v5735_v40 = vld [vmem:[%s7233_s1 + $0x7b0] sm:$0xff]  }
  0xb9   :  { %5193 = vmatpush3.bf16.msra.mxu1 %v5686_v39  ;;  %v5734_v39 = vld [vmem:[%s7233_s1 + $0x7f0] sm:$0xff]  }
  0xba   :  { %5194 = vmatprep.subr.bf16.mxu1 %v5689_v43 }
  0xbb   :  { %5173 = vmatpush3.bf16.msra.mxu0 %v5688_v42 }
  0xbc   :  { %5174 = vmatprep.subr.bf16.mxu0 %v5691_v45 }
  0xbd   :  { %5195 = vmatpush3.bf16.msra.mxu1 %v5690_v44  ;;  %v5736_v44 = vld [vmem:[%s7233_s1 + $0x768] sm:$0xff]  }
  0xbe   :  { %5196 = vmatprep.subr.bf16.mxu1 %v5693_v47 }
  0xbf   :  { %5175 = vmatpush3.bf16.msra.mxu0 %v5692_v46  ;;  %v5737_v46 = vld [vmem:[%s7233_s1 + $0x728] sm:$0xff]  }
  0xc0   :  { %5204 = vmatprep.subr.bf16.mxu0 %v5696_v50 }
  0xc1   :  { %5197 = vmatpush3.bf16.msra.mxu1 %v5695_v48 }
  0xc2   :  { %3963 = vmatmul.mubr.bf16.vlgmr.msra.gmra.mxu0 %v949_v49  ;;  %5226 = vmatprep.subr.bf16.mxu1 %v5698_v52  ;;  %v5738_v49 = vld [vmem:[%s7233_s1 + $0x7e8] sm:$0xff]  }
  0xc3   :  { %5205 = vmatpush3.bf16.msra.mxu0 %v5697_v51  ;;  %4042 = vmatprep.mubr.bf16.mxu0 %v1005_v23  ;;  %v5739_v52 = vld [vmem:[%s7233_s1 + $0x7a8] sm:$0xff]   ;;  %v5768_v23 = vld [vmem:[%s7233_s1 + $0x8b0] sm:$0xff]  }
  0xc4   :  { %4003 = vmatmul.mubr.bf16.vlgmr.msra.gmra.mxu1 %v965_v54  ;;  %5206 = vmatprep.subr.bf16.mxu0 %v5700_v55  ;;  %v5740_v54 = vld [vmem:[%s7233_s1 + $0x760] sm:$0xff]  }
  0xc5   :  { %5227 = vmatpush3.bf16.msra.mxu1 %v5699_v53  ;;  %4082 = vmatprep.mubr.bf16.mxu1 %v1015_v28  ;;  %v5770_v28 = vld [vmem:[%s7233_s1 + $0x828] sm:$0xff]  }
  0xc6   :  { %5228 = vmatprep.subr.bf16.mxu1 %v5702_v57  ;;  %v5741_v57 = vld [vmem:[%s7233_s1 + $0x720] sm:$0xff]  }
  0xc7   :  { %5207 = vmatpush3.bf16.msra.mxu0 %v5701_v56 }
  0xc8   :  { %5208 = vmatprep.subr.bf16.mxu0 %v5704_v59 }
  0xc9   :  { %5229 = vmatpush3.bf16.msra.mxu1 %v5703_v58  ;;  %v5742_v58 = vld [vmem:[%s7233_s1 + $0x7e0] sm:$0xff]  }
  0xca   :  { %5230 = vmatprep.subr.bf16.mxu1 %v5706_v61  ;;  %v5744_v61 = vld [vmem:[%s7233_s1 + $0x758] sm:$0xff]  }
  0xcb   :  { %5209 = vmatpush3.bf16.msra.mxu0 %v5705_v60  ;;  %v5743_v60 = vld [vmem:[%s7233_s1 + $0x7a0] sm:$0xff]  }
  0xcc   :  { %5210 = vmatprep.subr.bf16.mxu0 %v5708_v63  ;;  %v5746_v63 = vld [vmem:[%s7233_s1 + $0x7d8] sm:$0xff]  }
  0xcd   :  { %5231 = vmatpush3.bf16.msra.mxu1 %v5707_v62  ;;  %v5745_v62 = vld [vmem:[%s7233_s1 + $0x718] sm:$0xff]  }
  0xce   :  { %5232 = vmatprep.subr.bf16.mxu1 %v5710_v1  ;;  %v5748_v1 = vld [vmem:[%s7233_s1 + $0x750] sm:$0xff]  }
  0xcf   :  { %5211 = vmatpush3.bf16.msra.mxu0 %v5709_v0  ;;  %v5747_v0 = vld [vmem:[%s7233_s1 + $0x798] sm:$0xff]  }
  0xd0   :  { %5212 = vmatprep.subr.bf16.mxu0 %v5712_v3  ;;  %v5750_v3 = vld [vmem:[%s7233_s1 + $0x7d0] sm:$0xff]  }
  0xd1   :  { %5233 = vmatpush3.bf16.msra.mxu1 %v5711_v2  ;;  %v5749_v2 = vld [vmem:[%s7233_s1 + $0x710] sm:$0xff]  }
  0xd2   :  { %5234 = vmatprep.subr.bf16.mxu1 %v5714_v5  ;;  %v5752_v5 = vld [vmem:[%s7233_s1 + $0x748] sm:$0xff]  }
  0xd3   :  { %5213 = vmatpush3.bf16.msra.mxu0 %v5713_v4  ;;  %v5751_v4 = vld [vmem:[%s7233_s1 + $0x790] sm:$0xff]  }
  0xd4   :  { %5214 = vmatprep.subr.bf16.mxu0 %v5716_v7  ;;  %v5754_v7 = vld [vmem:[%s7233_s1 + $0x7c8] sm:$0xff]  }
  0xd5   :  { %5235 = vmatpush3.bf16.msra.mxu1 %v5715_v6  ;;  %v5753_v6 = vld [vmem:[%s7233_s1 + $0x708] sm:$0xff]  }
  0xd6   :  { %5236 = vmatprep.subr.bf16.mxu1 %v5718_v9  ;;  %v5756_v9 = vld [vmem:[%s7233_s1 + $0x740] sm:$0xff]  }
  0xd7   :  { %5215 = vmatpush3.bf16.msra.mxu0 %v5717_v8  ;;  %v5755_v8 = vld [vmem:[%s7233_s1 + $0x788] sm:$0xff]  }
  0xd8   :  { %5216 = vmatprep.subr.bf16.mxu0 %v5720_v11  ;;  %v5758_v11 = vld [vmem:[%s7233_s1 + $0x7c0] sm:$0xff]  }
  0xd9   :  { %5237 = vmatpush3.bf16.msra.mxu1 %v5719_v10  ;;  %v5757_v10 = vld [vmem:[%s7233_s1 + $0x700] sm:$0xff]  }
  0xda   :  { %5238 = vmatprep.subr.bf16.mxu1 %v5722_v13  ;;  %v998_v13 = vrot.slane %v6657_v20, %v6050_v41  ;;  %v5766_v20 = vld [vmem:[%s7233_s1 + $0x830] sm:$0xff]  }
  0xdb   :  { %5217 = vmatpush3.bf16.msra.mxu0 %v5721_v16  ;;  %v5763_v16 = vld [vmem:[%s7233_s1 + $0x8f8] sm:$0xff]  }
  0xdc   :  { %5218 = vmatprep.subr.bf16.mxu0 %v5724_v18  ;;  %v1014_v18 = vcombine.high %v998_v13, %v998_v13 }
  0xdd   :  { %5239 = vmatpush3.bf16.msra.mxu1 %v5723_v17  ;;  %v5764_v17 = vld [vmem:[%s7233_s1 + $0x8b8] sm:$0xff]  }
  0xde   :  { %5240 = vmatprep.subr.bf16.mxu1 %v5726_v22  ;;  %v5767_v22 = vld [vmem:[%s7233_s1 + $0x8f0] sm:$0xff]  }
  0xdf   :  { %5219 = vmatpush3.bf16.msra.mxu0 %v5725_v21 }
  0xe0   :  { %5248 = vmatprep.subr.bf16.mxu0 %v5728_v27 }
  0xe1   :  { %5241 = vmatpush3.bf16.msra.mxu1 %v5727_v25 }
  0xe2   :  { %v4956_v37 = vpop.f32.mrf.mxu0  ;;  %4043 = vmatmul.mubr.bf16.vlgmr.msra.gmra.mxu0 %v991_v26  ;;  %5270 = vmatprep.subr.bf16.mxu1 %v5730_v31  ;;  %v5769_v26 = vld [vmem:[%s7233_s1 + $0x868] sm:$0xff]  }
  0xe3   :  { %5249 = vmatpush3.bf16.msra.mxu0 %v5729_v29  ;;  %4122 = vmatprep.mubr.bf16.mxu0 %v1012_v30  ;;  %v5771_v31 = vld [vmem:[%s7233_s1 + $0x8e8] sm:$0xff]  }
  0xe4   :  { %v4957_v42 = vpop.f32.mrf.mxu0  ;;  %v4978_v43 = vpop.f32.mrf.mxu1  ;;  %4083 = vmatmul.mubr.bf16.vlgmr.msra.gmra.mxu1 %v1013_v33  ;;  %5250 = vmatprep.subr.bf16.mxu0 %v5732_v34  ;;  %v5772_v34 = vld [vmem:[%s7233_s1 + $0x8a8] sm:$0xff]  }
  0xe5   :  { %v4958_v45 = vadd.f32 %v4957_v42, %v4956_v37  ;;  %5271 = vmatpush3.bf16.msra.mxu1 %v5731_v32  ;;  %4162 = vmatprep.mubr.bf16.mxu1 %v1016_v36  ;;  %v5773_v36 = vld [vmem:[%s7233_s1 + $0x860] sm:$0xff]  }
  0xe6   :  { %v4959_v47 = vpop.f32.mrf.mxu0  ;;  %v4979_v48 = vpop.f32.mrf.mxu1  ;;  %5272 = vmatprep.subr.bf16.mxu1 %v5734_v39  ;;  %v5774_v39 = vld [vmem:[%s7233_s1 + $0x820] sm:$0xff]  }
  0xe7   :  { %v3565_v50 = vadd.f32 %v4958_v45, %v4546_v38  ;;  %v4980_v51 = vadd.f32 %v4979_v48, %v4978_v43  ;;  %5251 = vmatpush3.bf16.msra.mxu0 %v5733_v35  ;;  %v5776_v43 = vld [vmem:[%s7233_s1 + $0x8a0] sm:$0xff]   ;;  %v5778_v45 = vld [vmem:[%s7233_s1 + $0x818] sm:$0xff]   ;;  %v5781_v48 = vld [vmem:[%s7233_s1 + $0x850] sm:$0xff]  }
  0xe8   :  { %v4960_v53 = vpop.f32.mrf.mxu0  ;;  %5252 = vmatprep.subr.bf16.mxu0 %v5736_v44  ;;  %v4981_v55 = vpop.f32.mrf.mxu1  ;;  %v5777_v44 = vld [vmem:[%s7233_s1 + $0x858] sm:$0xff]  }
  0xe9   :  { %v6715_v56 = vadd.f32 %v4980_v51, %v3565_v50  ;;  %5273 = vmatpush3.bf16.msra.mxu1 %v5735_v40  ;;  %v5775_v40 = vld [vmem:[%s7233_s1 + $0x8e0] sm:$0xff]   ;;  %v5780_v47 = vld [vmem:[%s7233_s1 + $0x898] sm:$0xff]   ;;  %v5783_v50 = vld [vmem:[%s7233_s1 + $0x8d0] sm:$0xff]  }
  0xea   :  { %5274 = vmatprep.subr.bf16.mxu1 %v5738_v49  ;;  %v4982_v59 = vpop.f32.mrf.mxu1  ;;  %v5782_v49 = vld [vmem:[%s7233_s1 + $0x810] sm:$0xff]   ;;  %v5786_v53 = vld [vmem:[%s7233_s1 + $0x808] sm:$0xff]  }
  0xeb   :  { %5253 = vmatpush3.bf16.msra.mxu0 %v5737_v46  ;;  %v5779_v46 = vld [vmem:[%s7233_s1 + $0x8d8] sm:$0xff]   ;;  %v5784_v51 = vld [vmem:[%s7233_s1 + $0x890] sm:$0xff]   ;;  %v5787_v55 = vld [vmem:[%s7233_s1 + $0x8c8] sm:$0xff]  }
  0xec   :  { %5254 = vmatprep.subr.bf16.mxu0 %v5740_v54  ;;  %v20_v54 = vld [vmem:[%s7232_s0 + $0x20] sm:$0xff] }
  0xed   :  { %5275 = vmatpush3.bf16.msra.mxu1 %v5739_v52  ;;  %v5785_v52 = vld [vmem:[%s7233_s1 + $0x848] sm:$0xff]   ;;  %v5789_v59 = vld [vmem:[%s7233_s1 + $0x840] sm:$0xff]  }
  0xee   :  { %5276 = vmatprep.subr.bf16.mxu1 %v5742_v58  ;;  %v5788_v58 = vld [vmem:[%s7233_s1 + $0x888] sm:$0xff]  }
  0xef   :  { %5255 = vmatpush3.bf16.msra.mxu0 %v5741_v57  ;;  %v1017_v57 = vcombine.high %v20_v54, %v20_v54 }
  0xf0   :  { %5256 = vmatprep.subr.bf16.mxu0 %v5744_v61 }
  0xf1   :  { %5277 = vmatpush3.bf16.msra.mxu1 %v5743_v60  ;;  %v6871_v61 = vrot.slane %v1017_v57, %v6050_v41  ;;  %v5829_v57 = vld [vmem:[%s7233_s1 + $0xab8] sm:$0xff]  }
  0xf2   :  { %5278 = vmatprep.subr.bf16.mxu1 %v5746_v63  ;;  %v5791_v63 = vld [vmem:[%s7233_s1 + $0x8c0] sm:$0xff]  }
  0xf3   :  { %5257 = vmatpush3.bf16.msra.mxu0 %v5745_v62  ;;  %v5790_v62 = vld [vmem:[%s7233_s1 + $0x800] sm:$0xff]  }
  0xf4   :  { %5258 = vmatprep.subr.bf16.mxu0 %v5748_v1  ;;  %v1033_v1 = vcombine.high %v6871_v61, %v6871_v61 }
  0xf5   :  { %5279 = vmatpush3.bf16.msra.mxu1 %v5747_v0 }
  0xf6   :  { %5280 = vmatprep.subr.bf16.mxu1 %v5750_v3 }
  0xf7   :  { %5259 = vmatpush3.bf16.msra.mxu0 %v5749_v2  ;;  %v5792_v2 = vld [vmem:[%s7233_s1 + $0x880] sm:$0xff]  }
  0xf8   :  { %5260 = vmatprep.subr.bf16.mxu0 %v5752_v5 }
  0xf9   :  { %5281 = vmatpush3.bf16.msra.mxu1 %v5751_v4  ;;  %v5793_v4 = vld [vmem:[%s7233_s1 + $0x978] sm:$0xff]  }
  0xfa   :  { %5282 = vmatprep.subr.bf16.mxu1 %v5754_v7  ;;  %v1061_v7 = vrot.slane %v1033_v1, %v6050_v41 }
  0xfb   :  { %5261 = vmatpush3.bf16.msra.mxu0 %v5753_v6  ;;  %v5794_v6 = vld [vmem:[%s7233_s1 + $0x938] sm:$0xff]  }
  0xfc   :  { %5262 = vmatprep.subr.bf16.mxu0 %v5756_v9  ;;  %v5796_v9 = vld [vmem:[%s7233_s1 + $0x9b8] sm:$0xff]  }
  0xfd   :  { %5283 = vmatpush3.bf16.msra.mxu1 %v5755_v8  ;;  %v5795_v8 = vld [vmem:[%s7233_s1 + $0x9f8] sm:$0xff]  }
  0xfe   :  { %5284 = vmatprep.subr.bf16.mxu1 %v5758_v11  ;;  %v5797_v11 = vld [vmem:[%s7233_s1 + $0x970] sm:$0xff]  }
  0xff   :  { %5263 = vmatpush3.bf16.msra.mxu0 %v5757_v10 }
 0x100   :  { %5292 = vmatprep.subr.bf16.mxu0 %v5761_v14 }
 0x101   :  { %5285 = vmatpush3.bf16.msra.mxu1 %v5760_v12  ;;  %v5798_v12 = vld [vmem:[%s7233_s1 + $0x930] sm:$0xff]  }
 0x102   :  { %v5000_v21 = vpop.f32.mrf.mxu0  ;;  %4123 = vmatmul.mubr.bf16.vlgmr.msra.gmra.mxu0 %v998_v13  ;;  %5314 = vmatprep.subr.bf16.mxu1 %v5763_v16  ;;  %v1065_v13 = vcombine.high %v1061_v7, %v1061_v7  ;;  %v5800_v16 = vld [vmem:[%s7233_s1 + $0x9b0] sm:$0xff]  }
 0x103   :  { %5293 = vmatpush3.bf16.msra.mxu0 %v5762_v15  ;;  %v5799_v15 = vld [vmem:[%s7233_s1 + $0x9f0] sm:$0xff]  }
 0x104   :  { %v5001_v24 = vpop.f32.mrf.mxu0  ;;  %v5022_v25 = vpop.f32.mrf.mxu1  ;;  %4163 = vmatmul.mubr.bf16.vlgmr.msra.gmra.mxu1 %v1014_v18  ;;  %5294 = vmatprep.subr.bf16.mxu0 %v5765_v19  ;;  %v5801_v19 = vld [vmem:[%s7233_s1 + $0x968] sm:$0xff]  }
 0x105   :  { %v5002_v27 = vadd.f32 %v5001_v24, %v5000_v21  ;;  %5315 = vmatpush3.bf16.msra.mxu1 %v5764_v17  ;;  %v5802_v21 = vld [vmem:[%s7233_s1 + $0x928] sm:$0xff]  }
 0x106   :  { %v5003_v29 = vpop.f32.mrf.mxu0  ;;  %v5023_v30 = vpop.f32.mrf.mxu1  ;;  %5316 = vmatprep.subr.bf16.mxu1 %v5767_v22  ;;  %v5803_v24 = vld [vmem:[%s7233_s1 + $0x9e8] sm:$0xff]  }
 0x107   :  { %v3645_v32 = vadd.f32 %v5002_v27, %v6715_v56  ;;  %v5024_v33 = vadd.f32 %v5023_v30, %v5022_v25  ;;  %5295 = vmatpush3.bf16.msra.mxu0 %v5766_v20  ;;  %v1024_v56 = vrot.slane %v20_v54, %v6050_v41  ;;  %v5804_v27 = vld [vmem:[%s7233_s1 + $0x9a8] sm:$0xff]   ;;  %v5805_v29 = vld [vmem:[%s7233_s1 + $0x960] sm:$0xff]   ;;  %v5826_v54 = vld [vmem:[%s7233_s1 + $0xa78] sm:$0xff]  }
 0x108   :  { %v5004_v35 = vpop.f32.mrf.mxu0  ;;  %5296 = vmatprep.subr.bf16.mxu0 %v5769_v26  ;;  %v5025_v37 = vpop.f32.mrf.mxu1 }
 0x109   :  { %v6816_v38 = vadd.f32 %v5024_v33, %v3645_v32  ;;  %5317 = vmatpush3.bf16.msra.mxu1 %v5768_v23  ;;  %v1032_v60 = vcombine.high %v1024_v56, %v1024_v56  ;;  %v1040_v3 = vrot.slane %v1024_v56, %v6050_v41  ;;  %v5806_v32 = vld [vmem:[%s7233_s1 + $0x920] sm:$0xff]   ;;  %v5810_v37 = vld [vmem:[%s7233_s1 + $0x918] sm:$0xff]  }
 0x10a   :  { %5318 = vmatprep.subr.bf16.mxu1 %v5771_v31  ;;  %v5026_v42 = vpop.f32.mrf.mxu1  ;;  %v5807_v33 = vld [vmem:[%s7233_s1 + $0x9e0] sm:$0xff]   ;;  %v5828_v56 = vld [vmem:[%s7233_s1 + $0xaf8] sm:$0xff]  }
 0x10b   :  { %5297 = vmatpush3.bf16.msra.mxu0 %v5770_v28  ;;  %v1054_v0 = vrot.slane %v1032_v60, %v6050_v41  ;;  %v1062_v10 = vcombine.high %v1040_v3, %v1040_v3  ;;  %v5808_v35 = vld [vmem:[%s7233_s1 + $0x9a0] sm:$0xff]   ;;  %v5814_v42 = vld [vmem:[%s7233_s1 + $0x910] sm:$0xff]  }
 0x10c   :  { %5298 = vmatprep.subr.bf16.mxu0 %v5773_v36  ;;  %v5809_v36 = vld [vmem:[%s7233_s1 + $0x958] sm:$0xff]   ;;  %v5831_v60 = vld [vmem:[%s7233_s1 + $0xa30] sm:$0xff]  }
 0x10d   :  { %5319 = vmatpush3.bf16.msra.mxu1 %v5772_v34  ;;  %4202 = vmatprep.mubr.bf16.mxu0 %v1054_v0  ;;  %v1064_v5 = vcombine.high %v1054_v0, %v1054_v0 }
 0x10e   :  { %5320 = vmatprep.subr.bf16.mxu1 %v5775_v40  ;;  %v5813_v40 = vld [vmem:[%s7233_s1 + $0x950] sm:$0xff]  }
 0x10f   :  { %5299 = vmatpush3.bf16.msra.mxu0 %v5774_v39  ;;  %4242 = vmatprep.mubr.bf16.mxu1 %v1064_v5  ;;  %v5812_v39 = vld [vmem:[%s7233_s1 + $0x998] sm:$0xff]  }
 0x110   :  { %5300 = vmatprep.subr.bf16.mxu0 %v5777_v44  ;;  %v5816_v44 = vld [vmem:[%s7233_s1 + $0x990] sm:$0xff]  }
 0x111   :  { %5321 = vmatpush3.bf16.msra.mxu1 %v5776_v43  ;;  %v5815_v43 = vld [vmem:[%s7233_s1 + $0x9d0] sm:$0xff]  }
 0x112   :  { %5322 = vmatprep.subr.bf16.mxu1 %v5779_v46  ;;  %v5818_v46 = vld [vmem:[%s7233_s1 + $0x908] sm:$0xff]  }
 0x113   :  { %5301 = vmatpush3.bf16.msra.mxu0 %v5778_v45  ;;  %v5817_v45 = vld [vmem:[%s7233_s1 + $0x948] sm:$0xff]  }
 0x114   :  { %5302 = vmatprep.subr.bf16.mxu0 %v5781_v48  ;;  %v5820_v48 = vld [vmem:[%s7233_s1 + $0x988] sm:$0xff]  }
 0x115   :  { %5323 = vmatpush3.bf16.msra.mxu1 %v5780_v47  ;;  %v5819_v47 = vld [vmem:[%s7233_s1 + $0x9c8] sm:$0xff]  }
 0x116   :  { %5324 = vmatprep.subr.bf16.mxu1 %v5783_v50  ;;  %v5822_v50 = vld [vmem:[%s7233_s1 + $0x900] sm:$0xff]  }
 0x117   :  { %5303 = vmatpush3.bf16.msra.mxu0 %v5782_v49  ;;  %v5821_v49 = vld [vmem:[%s7233_s1 + $0x940] sm:$0xff]  }
 0x118   :  { %5304 = vmatprep.subr.bf16.mxu0 %v5785_v52  ;;  %v5825_v52 = vld [vmem:[%s7233_s1 + $0x980] sm:$0xff]  }
 0x119   :  { %5325 = vmatpush3.bf16.msra.mxu1 %v5784_v51  ;;  %v5823_v51 = vld [vmem:[%s7233_s1 + $0x9c0] sm:$0xff]  }
 0x11a   :  { %5326 = vmatprep.subr.bf16.mxu1 %v5787_v55  ;;  %v5827_v55 = vld [vmem:[%s7233_s1 + $0xa38] sm:$0xff]  }
 0x11b   :  { %5305 = vmatpush3.bf16.msra.mxu0 %v5786_v53  ;;  %v1047_v53 = vrot.slane %v6871_v61, %v6050_v41 }
 0x11c   :  { %5306 = vmatprep.subr.bf16.mxu0 %v5789_v59  ;;  %v5830_v59 = vld [vmem:[%s7233_s1 + $0xa70] sm:$0xff]  }
 0x11d   :  { %5327 = vmatpush3.bf16.msra.mxu1 %v5788_v58  ;;  %v1063_v58 = vcombine.high %v1047_v53, %v1047_v53 }
 0x11e   :  { %5328 = vmatprep.subr.bf16.mxu1 %v5791_v63  ;;  %v5833_v63 = vld [vmem:[%s7233_s1 + $0xab0] sm:$0xff]  }
 0x11f   :  { %5307 = vmatpush3.bf16.msra.mxu0 %v5790_v62  ;;  %v5832_v62 = vld [vmem:[%s7233_s1 + $0xaf0] sm:$0xff]  }
 0x120   :  { %5336 = vmatprep.subr.bf16.mxu0 %v5793_v4  ;;  %v5835_v4 = vld [vmem:[%s7233_s1 + $0xa28] sm:$0xff]  }
 0x121   :  { %5329 = vmatpush3.bf16.msra.mxu1 %v5792_v2  ;;  %v5834_v2 = vld [vmem:[%s7233_s1 + $0xa68] sm:$0xff]  }
 0x122   :  { %v5044_v14 = vpop.f32.mrf.mxu0  ;;  %4203 = vmatmul.mubr.bf16.vlgmr.msra.gmra.mxu0 %v1040_v3  ;;  %5358 = vmatprep.subr.bf16.mxu1 %v5795_v8 }
 0x123   :  { %5337 = vmatpush3.bf16.msra.mxu0 %v5794_v6  ;;  %4282 = vmatprep.mubr.bf16.mxu0 %v1061_v7  ;;  %v5836_v7 = vld [vmem:[%s7233_s1 + $0xae8] sm:$0xff]  }
 0x124   :  { %v5045_v17 = vpop.f32.mrf.mxu0  ;;  %v5066_v18 = vpop.f32.mrf.mxu1  ;;  %4243 = vmatmul.mubr.bf16.vlgmr.msra.gmra.mxu1 %v1062_v10  ;;  %5338 = vmatprep.subr.bf16.mxu0 %v5797_v11  ;;  %v5837_v10 = vld [vmem:[%s7233_s1 + $0xaa8] sm:$0xff]  }
 0x125   :  { %v5046_v20 = vadd.f32 %v5045_v17, %v5044_v14  ;;  %5359 = vmatpush3.bf16.msra.mxu1 %v5796_v9  ;;  %4322 = vmatprep.mubr.bf16.mxu1 %v1065_v13 }
 0x126   :  { %v5047_v22 = vpop.f32.mrf.mxu0  ;;  %v5067_v23 = vpop.f32.mrf.mxu1  ;;  %5360 = vmatprep.subr.bf16.mxu1 %v5799_v15  ;;  %v5839_v15 = vld [vmem:[%s7233_s1 + $0xa20] sm:$0xff]  }
 0x127   :  { %v3725_v25 = vadd.f32 %v5046_v20, %v6816_v38  ;;  %v5068_v26 = vadd.f32 %v5067_v23, %v5066_v18  ;;  %5339 = vmatpush3.bf16.msra.mxu0 %v5798_v12  ;;  %v5811_v38 = vld [vmem:[%s7233_s1 + $0x9d8] sm:$0xff]   ;;  %v5838_v12 = vld [vmem:[%s7233_s1 + $0xa60] sm:$0xff]   ;;  %v5846_v23 = vld [vmem:[%s7233_s1 + $0xa50] sm:$0xff]  }
 0x128   :  { %v5048_v28 = vpop.f32.mrf.mxu0  ;;  %5340 = vmatprep.subr.bf16.mxu0 %v5801_v19  ;;  %v5069_v30 = vpop.f32.mrf.mxu1  ;;  %v5841_v18 = vld [vmem:[%s7233_s1 + $0xaa0] sm:$0xff]   ;;  %v5842_v19 = vld [vmem:[%s7233_s1 + $0xa58] sm:$0xff]  }
 0x129   :  { %v6927_v31 = vadd.f32 %v5068_v26, %v3725_v25  ;;  %5361 = vmatpush3.bf16.msra.mxu1 %v5800_v16  ;;  %v5840_v16 = vld [vmem:[%s7233_s1 + $0xae0] sm:$0xff]   ;;  %v5843_v20 = vld [vmem:[%s7233_s1 + $0xa18] sm:$0xff]   ;;  %v5848_v25 = vld [vmem:[%s7233_s1 + $0xad0] sm:$0xff]  }
 0x12a   :  { %5362 = vmatprep.subr.bf16.mxu1 %v5803_v24  ;;  %v5070_v34 = vpop.f32.mrf.mxu1  ;;  %v5845_v22 = vld [vmem:[%s7233_s1 + $0xa98] sm:$0xff]   ;;  %v5847_v24 = vld [vmem:[%s7233_s1 + $0xa10] sm:$0xff]   ;;  %v5852_v28 = vld [vmem:[%s7233_s1 + $0xac8] sm:$0xff]  }
 0x12b   :  { %5341 = vmatpush3.bf16.msra.mxu0 %v5802_v21  ;;  %v5844_v21 = vld [vmem:[%s7233_s1 + $0xad8] sm:$0xff]   ;;  %v5849_v26 = vld [vmem:[%s7233_s1 + $0xa90] sm:$0xff]   ;;  %v5851_v30 = vld [vmem:[%s7233_s1 + $0xa08] sm:$0xff]  }
 0x12c   :  { %5342 = vmatprep.subr.bf16.mxu0 %v5805_v29  ;;  %v21_v29 = vld [vmem:[%s7232_s0 + $0x28] sm:$0xff] }
 0x12d   :  { %5363 = vmatpush3.bf16.msra.mxu1 %v5804_v27  ;;  %v5850_v27 = vld [vmem:[%s7233_s1 + $0xa48] sm:$0xff]  }
 0x12e   :  { %5364 = vmatprep.subr.bf16.mxu1 %v5807_v33  ;;  %v5854_v33 = vld [vmem:[%s7233_s1 + $0xa40] sm:$0xff]   ;;  %v5853_v34 = vld [vmem:[%s7233_s1 + $0xa88] sm:$0xff]  }
 0x12f   :  { %5343 = vmatpush3.bf16.msra.mxu0 %v5806_v32  ;;  %v1066_v32 = vcombine.high %v21_v29, %v21_v29 }
 0x130   :  { %5344 = vmatprep.subr.bf16.mxu0 %v5809_v36 }
 0x131   :  { %5365 = vmatpush3.bf16.msra.mxu1 %v5808_v35  ;;  %v7083_v36 = vrot.slane %v1066_v32, %v6050_v41 }
 0x132   :  { %5366 = vmatprep.subr.bf16.mxu1 %v5811_v38  ;;  %v5855_v38 = vld [vmem:[%s7233_s1 + $0xa00] sm:$0xff]  }
 0x133   :  { %5345 = vmatpush3.bf16.msra.mxu0 %v5810_v37  ;;  %v5856_v37 = vld [vmem:[%s7233_s1 + $0xac0] sm:$0xff]  }
 0x134   :  { %5346 = vmatprep.subr.bf16.mxu0 %v5813_v40  ;;  %v1082_v40 = vcombine.high %v7083_v36, %v7083_v36 }
 0x135   :  { %5367 = vmatpush3.bf16.msra.mxu1 %v5812_v39 }
 0x136   :  { %5368 = vmatprep.subr.bf16.mxu1 %v5815_v43  ;;  %v5858_v43 = vld [vmem:[%s7233_s1 + $0xb78] sm:$0xff]  }
 0x137   :  { %5347 = vmatpush3.bf16.msra.mxu0 %v5814_v42 }
 0x138   :  { %5348 = vmatprep.subr.bf16.mxu0 %v5817_v45 }
 0x139   :  { %5369 = vmatpush3.bf16.msra.mxu1 %v5816_v44  ;;  %v5857_v44 = vld [vmem:[%s7233_s1 + $0xa80] sm:$0xff]  }
 0x13a   :  { %5370 = vmatprep.subr.bf16.mxu1 %v5819_v47  ;;  %v5860_v47 = vld [vmem:[%s7233_s1 + $0xbf8] sm:$0xff]  }
 0x13b   :  { %5349 = vmatpush3.bf16.msra.mxu0 %v5818_v46  ;;  %v1110_v46 = vrot.slane %v1082_v40, %v6050_v41 }
 0x13c   :  { %5350 = vmatprep.subr.bf16.mxu0 %v5821_v49 }
 0x13d   :  { %5371 = vmatpush3.bf16.msra.mxu1 %v5820_v48  ;;  %v5859_v48 = vld [vmem:[%s7233_s1 + $0xb38] sm:$0xff]  }
 0x13e   :  { %5372 = vmatprep.subr.bf16.mxu1 %v5823_v51  ;;  %v5861_v51 = vld [vmem:[%s7233_s1 + $0xbb8] sm:$0xff]  }
 0x13f   :  { %5351 = vmatpush3.bf16.msra.mxu0 %v5822_v50  ;;  %v5862_v50 = vld [vmem:[%s7233_s1 + $0xb70] sm:$0xff]  }
 0x140   :  { %5380 = vmatprep.subr.bf16.mxu0 %v5826_v54  ;;  %v5864_v54 = vld [vmem:[%s7233_s1 + $0xbf0] sm:$0xff]  }
 0x141   :  { %5373 = vmatpush3.bf16.msra.mxu1 %v5825_v52  ;;  %v1114_v52 = vcombine.high %v1110_v46, %v1110_v46 }
 0x142   :  { %v5088_v61 = vpop.f32.mrf.mxu0  ;;  %4283 = vmatmul.mubr.bf16.vlgmr.msra.gmra.mxu0 %v1047_v53  ;;  %5402 = vmatprep.subr.bf16.mxu1 %v5828_v56 }
 0x143   :  { %5381 = vmatpush3.bf16.msra.mxu0 %v5827_v55  ;;  %v5863_v55 = vld [vmem:[%s7233_s1 + $0xb30] sm:$0xff]  }
 0x144   :  { %v5089_v0 = vpop.f32.mrf.mxu0  ;;  %v5110_v1 = vpop.f32.mrf.mxu1  ;;  %4323 = vmatmul.mubr.bf16.vlgmr.msra.gmra.mxu1 %v1063_v58  ;;  %5382 = vmatprep.subr.bf16.mxu0 %v5830_v59  ;;  %v5866_v58 = vld [vmem:[%s7233_s1 + $0xb68] sm:$0xff]  }
 0x145   :  { %v5090_v3 = vadd.f32 %v5089_v0, %v5088_v61  ;;  %5403 = vmatpush3.bf16.msra.mxu1 %v5829_v57 }
 0x146   :  { %v5091_v5 = vpop.f32.mrf.mxu0  ;;  %v5111_v6 = vpop.f32.mrf.mxu1  ;;  %5404 = vmatprep.subr.bf16.mxu1 %v5832_v62 }
 0x147   :  { %v3805_v8 = vadd.f32 %v5090_v3, %v6927_v31  ;;  %v5112_v9 = vadd.f32 %v5111_v6, %v5110_v1  ;;  %5383 = vmatpush3.bf16.msra.mxu0 %v5831_v60  ;;  %v1073_v31 = vrot.slane %v21_v29, %v6050_v41  ;;  %v5865_v60 = vld [vmem:[%s7233_s1 + $0xbb0] sm:$0xff]   ;;  %v5891_v29 = vld [vmem:[%s7233_s1 + $0xc38] sm:$0xff]  }
 0x148   :  { %v5092_v11 = vpop.f32.mrf.mxu0  ;;  %5384 = vmatprep.subr.bf16.mxu0 %v5834_v2  ;;  %v5113_v13 = vpop.f32.mrf.mxu1  ;;  %v5867_v2 = vld [vmem:[%s7233_s1 + $0xb28] sm:$0xff]  }
 0x149   :  { %v7028_v14 = vadd.f32 %v5112_v9, %v3805_v8  ;;  %5405 = vmatpush3.bf16.msra.mxu1 %v5833_v63  ;;  %v1081_v35 = vcombine.high %v1073_v31, %v1073_v31  ;;  %v1089_v42 = vrot.slane %v1073_v31, %v6050_v41  ;;  %v5868_v63 = vld [vmem:[%s7233_s1 + $0xbe8] sm:$0xff]   ;;  %v5872_v8 = vld [vmem:[%s7233_s1 + $0xbe0] sm:$0xff]   ;;  %v5874_v11 = vld [vmem:[%s7233_s1 + $0xb58] sm:$0xff]  }
 0x14a   :  { %5406 = vmatprep.subr.bf16.mxu1 %v5836_v7  ;;  %v5114_v17 = vpop.f32.mrf.mxu1  ;;  %v5869_v7 = vld [vmem:[%s7233_s1 + $0xba8] sm:$0xff]   ;;  %v5876_v13 = vld [vmem:[%s7233_s1 + $0xbd8] sm:$0xff]  }
 0x14b   :  { %5385 = vmatpush3.bf16.msra.mxu0 %v5835_v4  ;;  %v1103_v39 = vrot.slane %v1081_v35, %v6050_v41  ;;  %v1111_v49 = vcombine.high %v1089_v42, %v1089_v42  ;;  %v5870_v4 = vld [vmem:[%s7233_s1 + $0xb60] sm:$0xff]   ;;  %v5880_v17 = vld [vmem:[%s7233_s1 + $0xbd0] sm:$0xff]  }
 0x14c   :  { %5386 = vmatprep.subr.bf16.mxu0 %v5838_v12  ;;  %v5873_v12 = vld [vmem:[%s7233_s1 + $0xba0] sm:$0xff]  }
 0x14d   :  { %5407 = vmatpush3.bf16.msra.mxu1 %v5837_v10  ;;  %4362 = vmatprep.mubr.bf16.mxu0 %v1103_v39  ;;  %v1113_v45 = vcombine.high %v1103_v39, %v1103_v39  ;;  %v5871_v10 = vld [vmem:[%s7233_s1 + $0xb20] sm:$0xff]  }
 0x14e   :  { %5408 = vmatprep.subr.bf16.mxu1 %v5840_v16  ;;  %v5877_v16 = vld [vmem:[%s7233_s1 + $0xb98] sm:$0xff]  }
 0x14f   :  { %5387 = vmatpush3.bf16.msra.mxu0 %v5839_v15  ;;  %4402 = vmatprep.mubr.bf16.mxu1 %v1113_v45  ;;  %v5878_v15 = vld [vmem:[%s7233_s1 + $0xb50] sm:$0xff]  }
 0x150   :  { %5388 = vmatprep.subr.bf16.mxu0 %v5842_v19  ;;  %v5882_v19 = vld [vmem:[%s7233_s1 + $0xb48] sm:$0xff]  }
 0x151   :  { %5409 = vmatpush3.bf16.msra.mxu1 %v5841_v18  ;;  %v5879_v18 = vld [vmem:[%s7233_s1 + $0xb10] sm:$0xff]  }
 0x152   :  { %5410 = vmatprep.subr.bf16.mxu1 %v5844_v21  ;;  %v5884_v21 = vld [vmem:[%s7233_s1 + $0xbc8] sm:$0xff]  }
 0x153   :  { %5389 = vmatpush3.bf16.msra.mxu0 %v5843_v20  ;;  %v5881_v20 = vld [vmem:[%s7233_s1 + $0xb90] sm:$0xff]  }
 0x154   :  { %5390 = vmatprep.subr.bf16.mxu0 %v5846_v23  ;;  %v5886_v23 = vld [vmem:[%s7233_s1 + $0xb40] sm:$0xff]  }
 0x155   :  { %5411 = vmatpush3.bf16.msra.mxu1 %v5845_v22  ;;  %v5883_v22 = vld [vmem:[%s7233_s1 + $0xb08] sm:$0xff]  }
 0x156   :  { %5412 = vmatprep.subr.bf16.mxu1 %v5848_v25  ;;  %v5888_v25 = vld [vmem:[%s7233_s1 + $0xbc0] sm:$0xff]  }
 0x157   :  { %5391 = vmatpush3.bf16.msra.mxu0 %v5847_v24  ;;  %v5885_v24 = vld [vmem:[%s7233_s1 + $0xb88] sm:$0xff]  }
 0x158   :  { %5392 = vmatprep.subr.bf16.mxu0 %v5850_v27  ;;  %v1096_v27 = vrot.slane %v7083_v36, %v6050_v41 }
 0x159   :  { %5413 = vmatpush3.bf16.msra.mxu1 %v5849_v26  ;;  %v5887_v26 = vld [vmem:[%s7233_s1 + $0xb00] sm:$0xff]  }
 0x15a   :  { %5414 = vmatprep.subr.bf16.mxu1 %v5852_v28  ;;  %v5890_v28 = vld [vmem:[%s7233_s1 + $0xb80] sm:$0xff]   ;;  %v1112_v31 = vcombine.high %v1096_v27, %v1096_v27 }
 0x15b   :  { %5393 = vmatpush3.bf16.msra.mxu0 %v5851_v30  ;;  %v5922_v30 = vmov 0.0  }
 0x15c   :  { %5394 = vmatprep.subr.bf16.mxu0 %v5854_v33 }
 0x15d   :  { %5415 = vmatpush3.bf16.msra.mxu1 %v5853_v34 }
 0x15e   :  { %5416 = vmatprep.subr.bf16.mxu1 %v5856_v37 }
 0x15f   :  { %5395 = vmatpush3.bf16.msra.mxu0 %v5855_v38 }
 0x160   :  { %5424 = vmatprep.subr.bf16.mxu0 %v5858_v43 }
 0x161   :  { %5417 = vmatpush3.bf16.msra.mxu1 %v5857_v44 }
 0x162   :  { %v5132_v53 = vpop.f32.mrf.mxu0  ;;  %4363 = vmatmul.mubr.bf16.vlgmr.msra.gmra.mxu0 %v1089_v42  ;;  %5446 = vmatprep.subr.bf16.mxu1 %v5860_v47 }
 0x163   :  { %5425 = vmatpush3.bf16.msra.mxu0 %v5859_v48  ;;  %4442 = vmatprep.mubr.bf16.mxu0 %v1110_v46 }
 0x164   :  { %v5133_v56 = vpop.f32.mrf.mxu0  ;;  %v5154_v57 = vpop.f32.mrf.mxu1  ;;  %4403 = vmatmul.mubr.bf16.vlgmr.msra.gmra.mxu1 %v1111_v49  ;;  %5426 = vmatprep.subr.bf16.mxu0 %v5862_v50 }
 0x165   :  { %v5134_v59 = vadd.f32 %v5133_v56, %v5132_v53  ;;  %5447 = vmatpush3.bf16.msra.mxu1 %v5861_v51  ;;  %4482 = vmatprep.mubr.bf16.mxu1 %v1114_v52 }
 0x166   :  { %v5135_v61 = vpop.f32.mrf.mxu0  ;;  %v5155_v62 = vpop.f32.mrf.mxu1  ;;  %5448 = vmatprep.subr.bf16.mxu1 %v5864_v54 }
 0x167   :  { %v3885_v0 = vadd.f32 %v5134_v59, %v7028_v14  ;;  %v5156_v1 = vadd.f32 %v5155_v62, %v5154_v57  ;;  %5427 = vmatpush3.bf16.msra.mxu0 %v5863_v55  ;;  %v5875_v14 = vld [vmem:[%s7233_s1 + $0xb18] sm:$0xff]  }
 0x168   :  { %v5136_v3 = vpop.f32.mrf.mxu0  ;;  %5428 = vmatprep.subr.bf16.mxu0 %v5866_v58  ;;  %v5157_v5 = vpop.f32.mrf.mxu1 }
 0x169   :  { %v7136_v6 = vadd.f32 %v5156_v1, %v3885_v0  ;;  %5449 = vmatpush3.bf16.msra.mxu1 %v5865_v60 }
 0x16a   :  { %5450 = vmatprep.subr.bf16.mxu1 %v5868_v63  ;;  %v5158_v9 = vpop.f32.mrf.mxu1 }
 0x16b   :  { %5429 = vmatpush3.bf16.msra.mxu0 %v5867_v2 }
 0x16c   :  { %5430 = vmatprep.subr.bf16.mxu0 %v5870_v4 }
 0x16d   :  { %5451 = vmatpush3.bf16.msra.mxu1 %v5869_v7 }
 0x16e   :  { %5452 = vmatprep.subr.bf16.mxu1 %v5872_v8 }
 0x16f   :  { %5431 = vmatpush3.bf16.msra.mxu0 %v5871_v10 }
 0x170   :  { %5432 = vmatprep.subr.bf16.mxu0 %v5874_v11 }
 0x171   :  { %5453 = vmatpush3.bf16.msra.mxu1 %v5873_v12 }
 0x172   :  { %5454 = vmatprep.subr.bf16.mxu1 %v5876_v13 }
 0x173   :  { %5433 = vmatpush3.bf16.msra.mxu0 %v5875_v14 }
 0x174   :  { %5434 = vmatprep.subr.bf16.mxu0 %v5878_v15 }
 0x175   :  { %5455 = vmatpush3.bf16.msra.mxu1 %v5877_v16 }
 0x176   :  { %5456 = vmatprep.subr.bf16.mxu1 %v5880_v17 }
 0x177   :  { %5435 = vmatpush3.bf16.msra.mxu0 %v5879_v18 }
 0x178   :  { %5436 = vmatprep.subr.bf16.mxu0 %v5882_v19 }
 0x179   :  { %5457 = vmatpush3.bf16.msra.mxu1 %v5881_v20 }
 0x17a   :  { %5458 = vmatprep.subr.bf16.mxu1 %v5884_v21 }
 0x17b   :  { %5437 = vmatpush3.bf16.msra.mxu0 %v5883_v22 }
 0x17c   :  { %5438 = vmatprep.subr.bf16.mxu0 %v5886_v23 }
 0x17d   :  { %5459 = vmatpush3.bf16.msra.mxu1 %v5885_v24 }
 0x17e   :  { %5460 = vmatprep.subr.bf16.mxu1 %v5888_v25 }
 0x17f   :  { %5439 = vmatpush3.bf16.msra.mxu0 %v5887_v26 }
 0x180   :  { %5477 = vmatprep.subr.bf16.mxu0 %v5922_v30 }
 0x181   :  { %8 = vsyncpa [#allocation3], 0  ;;  %5461 = vmatpush3.bf16.msra.mxu1 %v5890_v28  ;;  %v5892_v33 = vld [vmem:[%s7233_s1 + $0xc30] sm:$0xff]   ;;  %vm5923_vm0 = vmmov 0   ;;  %v5893_v42 = vld [vmem:[%s7233_s1 + $0xc28] sm:$0xff]   ;;  %vm4530_vm1 = vcmask 58368  }
 0x182   :  { %v5176_v32 = vpop.f32.mrf.mxu0  ;;  %4443 = vmatmul.mubr.bf16.vlgmr.msra.gmra.mxu0 %v1096_v27  ;;  %v5894_v47 = vld [vmem:[%s7233_s1 + $0xc20] sm:$0xff]   ;;  %v5895_v48 = vld [vmem:[%s7233_s1 + $0xc18] sm:$0xff]   ;;  %v5896_v49 = vld [vmem:[%s7233_s1 + $0xc10] sm:$0xff]  }
 0x183   :  { %5478 = vmatpush3.bf16.msra.mxu0 %v5891_v29  ;;  %5493 = vmatprep.mubr.msk.bf16.mxu0 %vm5923_vm0, %v5922_v30  ;;  %v5897_v50 = vld [vmem:[%s7233_s1 + $0xc08] sm:$0xff]   ;;  %v5898_v51 = vld [vmem:[%s7233_s1 + $0xc00] sm:$0xff]   ;;  %v4547_v52 = vld.sshfl [vmem:[%s7232_s0 + $0x30] sm:$0x1 pattern:$0x75316420] }
 0x184   :  { %v5177_v34 = vpop.f32.mrf.mxu0  ;;  %v5198_v35 = vpop.f32.mrf.mxu1  ;;  %4483 = vmatmul.mubr.bf16.vlgmr.msra.gmra.mxu1 %v1112_v31  ;;  %5479 = vmatprep.subr.bf16.mxu0 %v5922_v30  ;;  %v1128_v53 = vrot.slane %v4547_v52, %v6050_v41  ;;  %s5924_s0 = smov [#allocation2]  }
 0x185   :  { %v5178_v36 = vadd.f32 %v5177_v34, %v5176_v32  ;;  %s4538_s1 = sshll.u32 %s5924_s0, 4  ;;  %s4539_s1 = int_to_ptr.vmem [resolvable:$true] %s4538_s1 }
 0x186   :  { %v5179_v37 = vpop.f32.mrf.mxu0  ;;  %v5199_v38 = vpop.f32.mrf.mxu1  ;;  %s5899_s17 = scalar_lea.vmem %s4539_s1, 32  ;;  %p5904_p1 = scmp.lt.s32.totalorder %s4539_s1, %s4539_s1 }
 0x187   :  { %v3965_v39 = vadd.f32 %v5178_v36, %v7136_v6  ;;  %v5200_v40 = vadd.f32 %v5199_v38, %v5198_v35  ;;  %5480 = vmatpush3.bf16.msra.mxu0 %v5892_v33  ;;  %p5900_p0 = scmp.ne.s32.totalorder %s4539_s1, %s5899_s17  ;;  %p5905_p2 = scmp.lt.s32.totalorder %s5899_s17, %s5899_s17 }
 0x188   :  { %v5180_v43 = vpop.f32.mrf.mxu0  ;;  %5481 = vmatprep.subr.bf16.mxu0 %v5922_v30  ;;  %v5201_v44 = vpop.f32.mrf.mxu1 }
 0x189   :  { %v4005_v45 = vadd.f32 %v5200_v40, %v3965_v39  ;;  %p5906_p3 = por %p5905_p2, %p5904_p1 }
 0x18a   :  { %v5202_v46 = vpop.f32.mrf.mxu1 }
 0x18b   :  { %5482 = vmatpush3.bf16.msra.mxu0 %v5893_v42  ;;  %p5907_p4 = pnand %p5906_p3, %p5900_p0 }
 0x18c   :  { %5483 = vmatprep.subr.bf16.mxu0 %v5922_v30 }
 0x18f   :  { %5484 = vmatpush3.bf16.msra.mxu0 %v5894_v47 }
 0x190   :  { %5485 = vmatprep.subr.bf16.mxu0 %v5922_v30 }
 0x193   :  { %5486 = vmatpush3.bf16.msra.mxu0 %v5895_v48 }
 0x194   :  { %5487 = vmatprep.subr.bf16.mxu0 %v5922_v30 }
 0x197   :  { %5488 = vmatpush3.bf16.msra.mxu0 %v5896_v49 }
 0x198   :  { %5489 = vmatprep.subr.bf16.mxu0 %v5922_v30 }
 0x19b   :  { %5490 = vmatpush3.bf16.msra.mxu0 %v5897_v50 }
 0x19c   :  { %5491 = vmatprep.subr.bf16.mxu0 %v5922_v30 }
 0x19f   :  { %5492 = vmatpush3.bf16.msra.mxu0 %v5898_v51 }
 0x1a2   :  { %v5220_v54 = vpop.f32.mrf.mxu0  ;;  %5494 = vmatmul.mubr.bf16.vlgmr.msra.gmra.mxu0 %v1128_v53 }
 0x1a4   :  { %v5221_v55 = vpop.f32.mrf.mxu0  ;;  %v5242_v56 = vpop.f32.mrf.mxu1 }
 0x1a5   :  { %v5222_v57 = vadd.f32 %v5221_v55, %v5220_v54 }
 0x1a6   :  { %v5223_v58 = vpop.f32.mrf.mxu0  ;;  %v5243_v59 = vpop.f32.mrf.mxu1 }
 0x1a7   :  { %v4045_v60 = vadd.f32 %v5222_v57, %v4005_v45  ;;  %v5244_v61 = vadd.f32 %v5243_v59, %v5242_v56 }
 0x1a8   :  { %v5224_v62 = vpop.f32.mrf.mxu0  ;;  %v5245_v63 = vpop.f32.mrf.mxu1 }
 0x1a9   :  { %v4085_v0 = vadd.f32 %v5244_v61, %v4045_v60 }
 0x1aa   :  { %v5246_v1 = vpop.f32.mrf.mxu1 }
 0x1c2   :  { %v5264_v2 = vpop.f32.mrf.mxu0 }
 0x1c4   :  { %v5265_v3 = vpop.f32.mrf.mxu0  ;;  %v5286_v4 = vpop.f32.mrf.mxu1 }
 0x1c5   :  { %v5266_v5 = vadd.f32 %v5265_v3, %v5264_v2 }
 0x1c6   :  { %v5267_v6 = vpop.f32.mrf.mxu0  ;;  %v5287_v41 = vpop.f32.mrf.mxu1 }
 0x1c7   :  { %v4125_v7 = vadd.f32 %v5266_v5, %v4085_v0  ;;  %v5288_v8 = vadd.f32 %v5287_v41, %v5286_v4 }
 0x1c8   :  { %v5268_v9 = vpop.f32.mrf.mxu0  ;;  %v5289_v10 = vpop.f32.mrf.mxu1 }
 0x1c9   :  { %v4165_v11 = vadd.f32 %v5288_v8, %v4125_v7 }
 0x1ca   :  { %v5290_v12 = vpop.f32.mrf.mxu1 }
 0x1e2   :  { %v5308_v13 = vpop.f32.mrf.mxu0 }
 0x1e4   :  { %v5309_v14 = vpop.f32.mrf.mxu0  ;;  %v5330_v15 = vpop.f32.mrf.mxu1 }
 0x1e5   :  { %v5310_v16 = vadd.f32 %v5309_v14, %v5308_v13 }
 0x1e6   :  { %v5311_v17 = vpop.f32.mrf.mxu0  ;;  %v5331_v18 = vpop.f32.mrf.mxu1 }
 0x1e7   :  { %v4205_v19 = vadd.f32 %v5310_v16, %v4165_v11  ;;  %v5332_v20 = vadd.f32 %v5331_v18, %v5330_v15 }
 0x1e8   :  { %v5312_v21 = vpop.f32.mrf.mxu0  ;;  %v5333_v22 = vpop.f32.mrf.mxu1 }
 0x1e9   :  { %v4245_v23 = vadd.f32 %v5332_v20, %v4205_v19 }
 0x1ea   :  { %v5334_v24 = vpop.f32.mrf.mxu1 }
 0x202   :  { %v5352_v25 = vpop.f32.mrf.mxu0 }
 0x204   :  { %v5353_v26 = vpop.f32.mrf.mxu0  ;;  %v5374_v27 = vpop.f32.mrf.mxu1 }
 0x205   :  { %v5354_v28 = vadd.f32 %v5353_v26, %v5352_v25 }
 0x206   :  { %v5355_v29 = vpop.f32.mrf.mxu0  ;;  %v5375_v30 = vpop.f32.mrf.mxu1 }
 0x207   :  { %v4285_v31 = vadd.f32 %v5354_v28, %v4245_v23  ;;  %v5376_v32 = vadd.f32 %v5375_v30, %v5374_v27 }
 0x208   :  { %v5356_v33 = vpop.f32.mrf.mxu0  ;;  %v5377_v34 = vpop.f32.mrf.mxu1 }
 0x209   :  { %v4325_v35 = vadd.f32 %v5376_v32, %v4285_v31 }
 0x20a   :  { %v5378_v36 = vpop.f32.mrf.mxu1 }
 0x222   :  { %v5396_v37 = vpop.f32.mrf.mxu0 }
 0x224   :  { %v5397_v38 = vpop.f32.mrf.mxu0  ;;  %v5418_v39 = vpop.f32.mrf.mxu1 }
 0x225   :  { %v5398_v54 = vadd.f32 %v5397_v38, %v5396_v37 }
 0x226   :  { %v5399_v40 = vpop.f32.mrf.mxu0  ;;  %v5419_v42 = vpop.f32.mrf.mxu1 }
 0x227   :  { %v4365_v55 = vadd.f32 %v5398_v54, %v4325_v35  ;;  %v5420_v56 = vadd.f32 %v5419_v42, %v5418_v39 }
 0x228   :  { %v5400_v43 = vpop.f32.mrf.mxu0  ;;  %v5421_v44 = vpop.f32.mrf.mxu1 }
 0x229   :  { %v4405_v58 = vadd.f32 %v5420_v56, %v4365_v55 }
 0x22a   :  { %v5422_v45 = vpop.f32.mrf.mxu1 }
 0x242   :  { %v5440_v46 = vpop.f32.mrf.mxu0 }
 0x244   :  { %v5441_v47 = vpop.f32.mrf.mxu0  ;;  %v5462_v48 = vpop.f32.mrf.mxu1 }
 0x245   :  { %v5442_v57 = vadd.f32 %v5441_v47, %v5440_v46 }
 0x246   :  { %v5443_v49 = vpop.f32.mrf.mxu0  ;;  %v5463_v50 = vpop.f32.mrf.mxu1 }
 0x247   :  { %v4445_v59 = vadd.f32 %v5442_v57, %v4405_v58  ;;  %v5464_v60 = vadd.f32 %v5463_v50, %v5462_v48 }
 0x248   :  { %v5444_v51 = vpop.f32.mrf.mxu0  ;;  %v5465_v52 = vpop.f32.mrf.mxu1 }
 0x249   :  { %v4485_v61 = vadd.f32 %v5464_v60, %v4445_v59 }
 0x24a   :  { %v5466_v53 = vpop.f32.mrf.mxu1 }
 0x262   :  { %v4524_v62 = vpop.f32.mrf.mxu0 }
 0x263   :  { %v4525_v63 = vadd.f32 %v4524_v62, %v4485_v61 }
 0x264   :  { %v5495_v0 = vpop.f32.mrf.mxu0 }
 0x265   :  { %4531 = vst.msk [vmem:[#allocation2] sm:$0x3] %vm4530_vm1, %v4525_v63 }
 0x266   :  { %v4527_v1 = vpop.f32.mrf.mxu0 }
 0x267   :  { %5910 = shalt.err (!%p5907_p4)
}
 0x268   :  { %4541 = dma.vmem_to_hbm [thread:$0]  %s4539_s1, 32, %s7235_s3, [#allocation3]   ;;  %v5496_v2 = vpop.f32.mrf.mxu0 }
 0x269   :  { %5919 = dma.done.wait [#allocation3], 32  }
 0x26a   :  { %5920 = vsyncadd [#allocation3], 4294967264 }
 0x26b   :  { %4545 = vsyncpa [#allocation3], 1 }

</bundles_post_ra>
